<compile_context>
chip_gen: v7x
topology: tpu7x:2x2x1
jax: 0.10.0
libtpu: 0.0.40
codegen_flags: <defaults>
</compile_context>

<pallas_src>
import jax
import jax.numpy as jnp
from jax.experimental import pallas as pl
from jax.experimental.pallas import tpu as pltpu


Z_DIM = 32
H1 = 256
H2 = 512
X_DIM = 784          # 6*128 + 16 -> lane-dense stores except a 16-lane masked tail
TB_MAX = 512         # amortizes grid-step overhead; fills 256-wide MXU M (v6e/v7x)


def _round_up(x, m):
    return (x + m - 1) // m * m


def _num_tensorcores():
    # v7x exposes 2 TensorCores per chip (the "parallel" grid axis shards across
    # them); v5e/v6e have 1.  Best-effort detection; default to 1.
    try:
        kind = jax.devices()[0].device_kind.lower()
    except Exception:
        return 1
    return 2 if "v7" in kind else 1


def _choose_batch_tile(batch):
    padded = _round_up(batch, 8)
    if padded <= TB_MAX:
        # Whole batch fits one tile.  On v7x, split into 2 tiles (when there is
        # enough work) so both TensorCores get a share of the batch axis.
        if _num_tensorcores() > 1 and padded >= 16:
            return _round_up(pl.cdiv(padded, 2), 8)
        return padded
    return TB_MAX


def decoder_kernel(z_ref, w1_ref, b1_ref, w2_ref, b2_ref, w3_ref, b3_ref, out_ref):
    # fc1 + ReLU  (bf16 MXU matmul, f32 accumulation)
    z = z_ref[...].astype(jnp.bfloat16)
    h1 = jnp.dot(z, w1_ref[...], preferred_element_type=jnp.float32)
    h1 = jnp.maximum(h1 + b1_ref[...], 0.0)

    # fc2 + ReLU
    h2 = jnp.dot(h1.astype(jnp.bfloat16), w2_ref[...],
                 preferred_element_type=jnp.float32)
    h2 = jnp.maximum(h2 + b2_ref[...], 0.0)

    # Dropout(p=0.2): identity in inference/eval mode.
    # TODO(synk): training-mode dropout would use pltpu.prng_seed +
    #             pltpu.stateful_bernoulli and scale by 1/(1-p).

    # fc3 + Sigmoid (direct 784-wide store, no padding / post-slice)
    logits = jnp.dot(h2.astype(jnp.bfloat16), w3_ref[...],
                     preferred_element_type=jnp.float32)
    out_ref[...] = jax.nn.sigmoid(logits + b3_ref[...]).astype(out_ref.dtype)


def prepare_params(w1, b1, w2, b2, w3, b3):
    """One-time parameter prep (hoisted out of the per-call path):
    bf16 weights (halves weight DMA, native MXU rate); biases stay f32."""
    return (w1.astype(jnp.bfloat16), b1.astype(jnp.float32),
            w2.astype(jnp.bfloat16), b2.astype(jnp.float32),
            w3.astype(jnp.bfloat16), b3.astype(jnp.float32))


def decoder_forward(z, prepped_params):
    """z: (B, Z_DIM) f32; prepped_params: output of prepare_params()."""
    w1b, b1, w2b, b2, w3b, b3 = prepped_params
    batch = z.shape[0]

    tb = _choose_batch_tile(batch)
    n_tiles = pl.cdiv(batch, tb)
    padded_b = n_tiles * tb
    if padded_b != batch:
        z = jnp.pad(z, ((0, padded_b - batch), (0, 0)))

    flops = 2 * padded_b * (Z_DIM * H1 + H1 * H2 + H2 * X_DIM)
    bytes_accessed = (
        2 * (Z_DIM * H1 + H1 * H2 + H2 * X_DIM)      # bf16 weights
        + 4 * (H1 + H2 + X_DIM)                      # f32 biases
        + 4 * padded_b * (Z_DIM + X_DIM))            # f32 activations in / out
    cost = pl.CostEstimate(flops=flops,
                           transcendentals=padded_b * X_DIM,  # sigmoid exp
                           bytes_accessed=bytes_accessed)

    out = pl.pallas_call(
        decoder_kernel,
        out_shape=jax.ShapeDtypeStruct((padded_b, X_DIM), jnp.float32),
        grid_spec=pltpu.PrefetchScalarGridSpec(
            num_scalar_prefetch=0,
            grid=(n_tiles,),
            in_specs=[
                pl.BlockSpec((tb, Z_DIM), lambda i: (i, 0)),     # z tile (pipelined)
                pl.BlockSpec((Z_DIM, H1), lambda i: (0, 0)),     # w1 (VMEM-resident)
                pl.BlockSpec((1, H1), lambda i: (0, 0)),         # b1
                pl.BlockSpec((H1, H2), lambda i: (0, 0)),        # w2
                pl.BlockSpec((1, H2), lambda i: (0, 0)),         # b2
                pl.BlockSpec((H2, X_DIM), lambda i: (0, 0)),     # w3
                pl.BlockSpec((1, X_DIM), lambda i: (0, 0)),      # b3
            ],
            out_specs=pl.BlockSpec((tb, X_DIM), lambda i: (i, 0)),
        ),
        compiler_params=pltpu.CompilerParams(
            dimension_semantics=("parallel",)),
        cost_estimate=cost,
    )(z, w1b, b1, w2b, b2, w3b, b3)

    if padded_b != batch:
        out = out[:batch]
    return out


def init_params(key):
    # Deterministic synthetic parameters (PyTorch-Linear-like uniform init).
    keys = jax.random.split(key, 6)

    def uniform(k, shape, fan_in):
        bound = 1.0 / jnp.sqrt(fan_in)
        return jax.random.uniform(k, shape, jnp.float32, -bound, bound)

    w1 = uniform(keys[0], (Z_DIM, H1), Z_DIM)
    b1 = uniform(keys[1], (1, H1), Z_DIM)
    w2 = uniform(keys[2], (H1, H2), H1)
    b2 = uniform(keys[3], (1, H2), H1)
    w3 = uniform(keys[4], (H2, X_DIM), H2)
    b3 = uniform(keys[5], (1, X_DIM), H2)
    return w1, b1, w2, b2, w3, b3


if __name__ == "__main__":
    key = jax.random.PRNGKey(0)
    k_z, k_p = jax.random.split(key)

    batch = 8
    z = jax.random.normal(k_z, (batch, Z_DIM), jnp.float32)
    params = init_params(k_p)

    # One-time weight prep (bf16 cast) -- not on the per-call path.
    prepped = prepare_params(*params)

    out = decoder_forward(z, prepped)
    out = jax.block_until_ready(out)

    # Reference in plain JAX, mirroring the kernel's bf16 weight/activation casts.
    w1, b1, w2, b2, w3, b3 = params
    rt = lambda a: a.astype(jnp.bfloat16).astype(jnp.float32)  # round-trip to bf16
    h1 = jnp.maximum(rt(z) @ rt(w1) + b1, 0.0)
    h2 = jnp.maximum(rt(h1) @ rt(w2) + b2, 0.0)
    ref = jax.nn.sigmoid(rt(h2) @ rt(w3) + b3)

    assert out.shape == (batch, X_DIM)
    assert jnp.allclose(out, ref, atol=2e-2, rtol=0.0)
    print("KERNEL_OK")
</pallas_src>

<mosaic_0001>
module attributes {stable_mosaic.version = 11 : i64} {
  func.func @decoder_kernel(%arg0: i32, %arg1: memref<8x32xf32, #tpu.memory_space<vmem>>, %arg2: memref<32x256xbf16, #tpu.memory_space<vmem>>, %arg3: memref<1x256xf32, #tpu.memory_space<vmem>>, %arg4: memref<256x512xbf16, #tpu.memory_space<vmem>>, %arg5: memref<1x512xf32, #tpu.memory_space<vmem>>, %arg6: memref<512x784xbf16, #tpu.memory_space<vmem>>, %arg7: memref<1x784xf32, #tpu.memory_space<vmem>>, %arg8: memref<8x784xf32, #tpu.memory_space<vmem>>) attributes {dimension_semantics = [#tpu.dimension_semantics<parallel>], iteration_bounds = array<i64: 1>, scalar_prefetch = 0 : i64, scratch_operands = 0 : i64, tpu.core_type = #tpu.core_type<tc>, window_params = [{transform_indices = @transform_0, window_bounds = array<i64: 8, 32>}, {pipeline_mode = #tpu.pipeline_mode<synchronous>, transform_indices = @transform_1, window_bounds = array<i64: 32, 256>}, {pipeline_mode = #tpu.pipeline_mode<synchronous>, transform_indices = @transform_2, window_bounds = array<i64: 1, 256>}, {pipeline_mode = #tpu.pipeline_mode<synchronous>, transform_indices = @transform_3, window_bounds = array<i64: 256, 512>}, {pipeline_mode = #tpu.pipeline_mode<synchronous>, transform_indices = @transform_4, window_bounds = array<i64: 1, 512>}, {pipeline_mode = #tpu.pipeline_mode<synchronous>, transform_indices = @transform_5, window_bounds = array<i64: 512, 784>}, {pipeline_mode = #tpu.pipeline_mode<synchronous>, transform_indices = @transform_6, window_bounds = array<i64: 1, 784>}, {transform_indices = @transform_7, window_bounds = array<i64: 8, 784>}]} {
    %c0 = arith.constant 0 : index
    %c0_0 = arith.constant 0 : index
    %0 = vector.load %arg1[%c0, %c0_0] : memref<8x32xf32, #tpu.memory_space<vmem>>, vector<8x32xf32>
    %1 = arith.truncf %0 : vector<8x32xf32> to vector<8x32xbf16>
    %c0_1 = arith.constant 0 : index
    %c0_2 = arith.constant 0 : index
    %2 = vector.load %arg2[%c0_1, %c0_2] : memref<32x256xbf16, #tpu.memory_space<vmem>>, vector<32x256xbf16>
    %cst = arith.constant dense<0.000000e+00> : vector<8x256xf32>
    %3 = tpu.matmul %1, %2, %cst {dimension_numbers = #tpu.dot_dimension_numbers<[1], [0], [0], [1], [0, 0, 1, 1], [], []>} : vector<8x32xbf16>, vector<32x256xbf16>, vector<8x256xf32> -> vector<8x256xf32>
    %c0_3 = arith.constant 0 : index
    %c0_4 = arith.constant 0 : index
    %4 = vector.load %arg3[%c0_3, %c0_4] : memref<1x256xf32, #tpu.memory_space<vmem>>, vector<1x256xf32>
    %5 = vector.broadcast %4 : vector<1x256xf32> to vector<8x256xf32>
    %6 = arith.addf %3, %5 : vector<8x256xf32>
    %cst_5 = arith.constant 0.000000e+00 : f32
    %7 = vector.broadcast %cst_5 : f32 to vector<8x256xf32>
    %8 = arith.maximumf %6, %7 : vector<8x256xf32>
    %9 = arith.truncf %8 : vector<8x256xf32> to vector<8x256xbf16>
    %c0_6 = arith.constant 0 : index
    %c0_7 = arith.constant 0 : index
    %10 = vector.load %arg4[%c0_6, %c0_7] : memref<256x512xbf16, #tpu.memory_space<vmem>>, vector<256x512xbf16>
    %cst_8 = arith.constant dense<0.000000e+00> : vector<8x512xf32>
    %11 = tpu.matmul %9, %10, %cst_8 {dimension_numbers = #tpu.dot_dimension_numbers<[1], [0], [0], [1], [0, 0, 1, 1], [], []>} : vector<8x256xbf16>, vector<256x512xbf16>, vector<8x512xf32> -> vector<8x512xf32>
    %c0_9 = arith.constant 0 : index
    %c0_10 = arith.constant 0 : index
    %12 = vector.load %arg5[%c0_9, %c0_10] : memref<1x512xf32, #tpu.memory_space<vmem>>, vector<1x512xf32>
    %13 = vector.broadcast %12 : vector<1x512xf32> to vector<8x512xf32>
    %14 = arith.addf %11, %13 : vector<8x512xf32>
    %cst_11 = arith.constant 0.000000e+00 : f32
    %15 = vector.broadcast %cst_11 : f32 to vector<8x512xf32>
    %16 = arith.maximumf %14, %15 : vector<8x512xf32>
    %17 = arith.truncf %16 : vector<8x512xf32> to vector<8x512xbf16>
    %c0_12 = arith.constant 0 : index
    %c0_13 = arith.constant 0 : index
    %18 = vector.load %arg6[%c0_12, %c0_13] : memref<512x784xbf16, #tpu.memory_space<vmem>>, vector<512x784xbf16>
    %cst_14 = arith.constant dense<0.000000e+00> : vector<8x784xf32>
    %19 = tpu.matmul %17, %18, %cst_14 {dimension_numbers = #tpu.dot_dimension_numbers<[1], [0], [0], [1], [0, 0, 1, 1], [], []>} : vector<8x512xbf16>, vector<512x784xbf16>, vector<8x784xf32> -> vector<8x784xf32>
    %c0_15 = arith.constant 0 : index
    %c0_16 = arith.constant 0 : index
    %20 = vector.load %arg7[%c0_15, %c0_16] : memref<1x784xf32, #tpu.memory_space<vmem>>, vector<1x784xf32>
    %21 = vector.broadcast %20 : vector<1x784xf32> to vector<8x784xf32>
    %22 = arith.addf %19, %21 : vector<8x784xf32>
    %23 = arith.negf %22 : vector<8x784xf32>
    %24 = math.exp %23 : vector<8x784xf32>
    %cst_17 = arith.constant 1.000000e+00 : f32
    %25 = vector.broadcast %cst_17 : f32 to vector<8x784xf32>
    %26 = arith.addf %25, %24 : vector<8x784xf32>
    %27 = arith.divf %25, %26 : vector<8x784xf32>
    %c0_18 = arith.constant 0 : index
    %c0_19 = arith.constant 0 : index
    %28 = vector.load %arg8[%c0_18, %c0_19] : memref<8x784xf32, #tpu.memory_space<vmem>>, vector<8x784xf32>
    tpu.vector_store %arg8[%c0_18, %c0_19], %27 {strides = array<i32>} : memref<8x784xf32, #tpu.memory_space<vmem>>, vector<8x784xf32>,
    return
  }
  func.func @transform_0(%arg0: i32) -> (i32, i32) {
    %c0_i32 = arith.constant 0 : i32
    %c0_i32_0 = arith.constant 0 : i32
    return %arg0, %c0_i32 : i32, i32
  }
  func.func @transform_1(%arg0: i32) -> (i32, i32) {
    %c0_i32 = arith.constant 0 : i32
    %c0_i32_0 = arith.constant 0 : i32
    %c0_i32_1 = arith.constant 0 : i32
    return %c0_i32, %c0_i32_0 : i32, i32
  }
  func.func @transform_2(%arg0: i32) -> (i32, i32) {
    %c0_i32 = arith.constant 0 : i32
    %c0_i32_0 = arith.constant 0 : i32
    %c0_i32_1 = arith.constant 0 : i32
    return %c0_i32, %c0_i32_0 : i32, i32
  }
  func.func @transform_3(%arg0: i32) -> (i32, i32) {
    %c0_i32 = arith.constant 0 : i32
    %c0_i32_0 = arith.constant 0 : i32
    %c0_i32_1 = arith.constant 0 : i32
    return %c0_i32, %c0_i32_0 : i32, i32
  }
  func.func @transform_4(%arg0: i32) -> (i32, i32) {
    %c0_i32 = arith.constant 0 : i32
    %c0_i32_0 = arith.constant 0 : i32
    %c0_i32_1 = arith.constant 0 : i32
    return %c0_i32, %c0_i32_0 : i32, i32
  }
  func.func @transform_5(%arg0: i32) -> (i32, i32) {
    %c0_i32 = arith.constant 0 : i32
    %c0_i32_0 = arith.constant 0 : i32
    %c0_i32_1 = arith.constant 0 : i32
    return %c0_i32, %c0_i32_0 : i32, i32
  }
  func.func @transform_6(%arg0: i32) -> (i32, i32) {
    %c0_i32 = arith.constant 0 : i32
    %c0_i32_0 = arith.constant 0 : i32
    %c0_i32_1 = arith.constant 0 : i32
    return %c0_i32, %c0_i32_0 : i32, i32
  }
  func.func @transform_7(%arg0: i32) -> (i32, i32) {
    %c0_i32 = arith.constant 0 : i32
    %c0_i32_0 = arith.constant 0 : i32
    return %arg0, %c0_i32 : i32, i32
  }
}

</mosaic_0001>

<bundles_post_ra>
// kernel: tpu_custom_call.1
= control target key start
LH: loop header
LB: loop body
LE: loop exit
PB: predicated region body
PF: predicated region fallthrough
CT: control target
= control target key end

     0   :  { %v3284_v2 = vmov 0   ;;  %vm66_vm0 = vcmask 261120   ;;  %s4295_s0 = inlined_call_operand.vmem [shape: f32[8,32], index: 0, kind: input, shape index: {}]   ;;  %s4296_s1 = inlined_call_operand.vmem [shape: bf16[32,256], index: 1, kind: input, shape index: {}]   ;;  %s4297_s2 = inlined_call_operand.vmem [shape: f32[1,256], index: 2, kind: input, shape index: {}]   ;;  %s4298_s3 = inlined_call_operand.vmem [shape: bf16[256,512], index: 3, kind: input, shape index: {}]   ;;  %s4299_s4 = inlined_call_operand.vmem [shape: f32[1,512], index: 4, kind: input, shape index: {}]   ;;  %s4300_s5 = inlined_call_operand.vmem [shape: bf16[512,784], index: 5, kind: input, shape index: {}]   ;;  %s4301_s6 = inlined_call_operand.vmem [shape: f32[1,784], index: 6, kind: input, shape index: {}]   ;;  %s4302_s7 = inlined_call_operand.hbm [shape: f32[8,784], index: 7, kind: output, shape index: {}]  }
   0x1   :  { %v2810_v0 = vld [vmem:[%s4296_s1 + $0x4] ss:$8 sps:$4 sm:$0xff]   ;;  %v2812_v1 = vld [vmem:[%s4296_s1] ss:$8 sps:$4 sm:$0xff]   ;;  %102 = vmatprep.mubr.bf16.mxu0 %v3284_v2  ;;  %v2813_v3 = vld [vmem:[%s4296_s1 + $0x14] ss:$8 sps:$4 sm:$0xff]  }
   0x2   :  { %70 = vmatprep.subr.bf16.mxu0 %v2810_v0  ;;  %v2815_v4 = vld [vmem:[%s4296_s1 + $0x10] ss:$8 sps:$4 sm:$0xff]   ;;  %v28_v5 = vld [vmem:[%s4295_s0] sm:$0xff]  ;;  %v2820_v7 = vld [vmem:[%s4298_s3 + $0xc] ss:$16 sps:$4 sm:$0xff]  }
   0x3   :  { %71 = vmatpush1.bf16.msra.mxu0 %v2812_v1  ;;  %v2816_v6 = vld [vmem:[%s4298_s3 + $0x4] ss:$16 sps:$4 sm:$0xff]   ;;  %v2821_v8 = vld [vmem:[%s4298_s3] ss:$16 sps:$4 sm:$0xff]   ;;  %v29_v9 = vpack.c.bf16 %v28_v5, %v28_v5  ;;  %v2818_v11 = vld [vmem:[%s4298_s3 + $0x8] ss:$16 sps:$4 sm:$0xff]  }
   0x4   :  { %72 = vmatprep.subr.bf16.mxu0 %v2813_v3  ;;  %521 = vmatprep.subr.bf16.mxu1 %v2816_v6  ;;  %v2822_v10 = vld [vmem:[%s4298_s3 + $0x24] ss:$16 sps:$4 sm:$0xff]   ;;  %v2826_v12 = vld [vmem:[%s4298_s3 + $0x2c] ss:$16 sps:$4 sm:$0xff]   ;;  %v2827_v13 = vld [vmem:[%s4298_s3 + $0x20] ss:$16 sps:$4 sm:$0xff]  }
   0x5   :  { %522 = vmatpush1.bf16.msra.mxu1 %v2821_v8  ;;  %v2828_v14 = vld [vmem:[%s4298_s3 + $0x44] ss:$16 sps:$4 sm:$0xff]   ;;  %v2824_v15 = vld [vmem:[%s4298_s3 + $0x28] ss:$16 sps:$4 sm:$0xff]   ;;  %v2832_v16 = vld [vmem:[%s4298_s3 + $0x4c] ss:$16 sps:$4 sm:$0xff]  }
   0x6   :  { %523 = vmatprep.subr.bf16.mxu1 %v2822_v10  ;;  %v2833_v17 = vld [vmem:[%s4298_s3 + $0x40] ss:$16 sps:$4 sm:$0xff]   ;;  %v2834_v18 = vld [vmem:[%s4298_s3 + $0x64] ss:$16 sps:$4 sm:$0xff]   ;;  %v2830_v19 = vld [vmem:[%s4298_s3 + $0x48] ss:$16 sps:$4 sm:$0xff]  }
   0x7   :  { %73 = vmatpush1.bf16.msra.mxu0 %v2815_v4  ;;  %v2838_v20 = vld [vmem:[%s4298_s3 + $0x6c] ss:$16 sps:$4 sm:$0xff]   ;;  %v2839_v21 = vld [vmem:[%s4298_s3 + $0x60] ss:$16 sps:$4 sm:$0xff]   ;;  %v2840_v22 = vld [vmem:[%s4298_s3 + $0x84] ss:$16 sps:$4 sm:$0xff]  }
   0x8   :  { %562 = vmatprep.subr.bf16.mxu0 %v2820_v7  ;;  %v2836_v23 = vld [vmem:[%s4298_s3 + $0x68] ss:$16 sps:$4 sm:$0xff]   ;;  %v2844_v24 = vld [vmem:[%s4298_s3 + $0x8c] ss:$16 sps:$4 sm:$0xff]   ;;  %v2845_v25 = vld [vmem:[%s4298_s3 + $0x80] ss:$16 sps:$4 sm:$0xff]  }
   0x9   :  { %524 = vmatpush1.bf16.msra.mxu1 %v2827_v13  ;;  %v2846_v26 = vld [vmem:[%s4298_s3 + $0xa4] ss:$16 sps:$4 sm:$0xff]   ;;  %v2842_v27 = vld [vmem:[%s4298_s3 + $0x88] ss:$16 sps:$4 sm:$0xff]   ;;  %v2850_v28 = vld [vmem:[%s4298_s3 + $0xac] ss:$16 sps:$4 sm:$0xff]  }
   0xa   :  { %2450 = vmatmul.mubr.msk.bf16.vlgmr.msra.gmra.mrb[0].mxu0 %vm66_vm0, %v29_v9  ;;  %525 = vmatprep.subr.bf16.mxu1 %v2828_v14  ;;  %v2851_v29 = vld [vmem:[%s4298_s3 + $0xa0] ss:$16 sps:$4 sm:$0xff]   ;;  %v2852_v30 = vld [vmem:[%s4298_s3 + $0xc4] ss:$16 sps:$4 sm:$0xff]   ;;  %v2848_v31 = vld [vmem:[%s4298_s3 + $0xa8] ss:$16 sps:$4 sm:$0xff]  }
   0xb   :  { %563 = vmatpush1.bf16.msra.mxu0 %v2818_v11  ;;  %v2856_v32 = vld [vmem:[%s4298_s3 + $0xcc] ss:$16 sps:$4 sm:$0xff]   ;;  %v2857_v33 = vld [vmem:[%s4298_s3 + $0xc0] ss:$16 sps:$4 sm:$0xff]   ;;  %v2858_v34 = vld [vmem:[%s4298_s3 + $0xe4] ss:$16 sps:$4 sm:$0xff]  }
   0xc   :  { %564 = vmatprep.subr.bf16.mxu0 %v2826_v12  ;;  %v2854_v35 = vld [vmem:[%s4298_s3 + $0xc8] ss:$16 sps:$4 sm:$0xff]   ;;  %v2862_v36 = vld [vmem:[%s4298_s3 + $0xec] ss:$16 sps:$4 sm:$0xff]   ;;  %v2863_v37 = vld [vmem:[%s4298_s3 + $0xe0] ss:$16 sps:$4 sm:$0xff]  }
   0xd   :  { %526 = vmatpush1.bf16.msra.mxu1 %v2833_v17  ;;  %v2864_v38 = vld [vmem:[%s4298_s3 + $0x104] ss:$16 sps:$4 sm:$0xff]   ;;  %v2860_v39 = vld [vmem:[%s4298_s3 + $0xe8] ss:$16 sps:$4 sm:$0xff]   ;;  %v2868_v40 = vld [vmem:[%s4298_s3 + $0x10c] ss:$16 sps:$4 sm:$0xff]  }
   0xe   :  { %527 = vmatprep.subr.bf16.mxu1 %v2834_v18  ;;  %v2869_v41 = vld [vmem:[%s4298_s3 + $0x100] ss:$16 sps:$4 sm:$0xff]   ;;  %v2870_v42 = vld [vmem:[%s4298_s3 + $0x124] ss:$16 sps:$4 sm:$0xff]   ;;  %v2866_v43 = vld [vmem:[%s4298_s3 + $0x108] ss:$16 sps:$4 sm:$0xff]  }
   0xf   :  { %565 = vmatpush1.bf16.msra.mxu0 %v2824_v15  ;;  %v2875_v44 = vld [vmem:[%s4298_s3 + $0x120] ss:$16 sps:$4 sm:$0xff]   ;;  %v2874_v45 = vld [vmem:[%s4298_s3 + $0x12c] ss:$16 sps:$4 sm:$0xff]   ;;  %v2876_v46 = vld [vmem:[%s4298_s3 + $0x144] ss:$16 sps:$4 sm:$0xff]  }
  0x10   :  { %566 = vmatprep.subr.bf16.mxu0 %v2832_v16  ;;  %v2872_v47 = vld [vmem:[%s4298_s3 + $0x128] ss:$16 sps:$4 sm:$0xff]   ;;  %v2881_v48 = vld [vmem:[%s4298_s3 + $0x140] ss:$16 sps:$4 sm:$0xff]   ;;  %v2880_v49 = vld [vmem:[%s4298_s3 + $0x14c] ss:$16 sps:$4 sm:$0xff]  }
  0x11   :  { %528 = vmatpush1.bf16.msra.mxu1 %v2839_v21  ;;  %v2882_v50 = vld [vmem:[%s4298_s3 + $0x164] ss:$16 sps:$4 sm:$0xff]   ;;  %v2878_v51 = vld [vmem:[%s4298_s3 + $0x148] ss:$16 sps:$4 sm:$0xff]   ;;  %v2887_v52 = vld [vmem:[%s4298_s3 + $0x160] ss:$16 sps:$4 sm:$0xff]  }
  0x12   :  { %529 = vmatprep.subr.bf16.mxu1 %v2840_v22  ;;  %v2886_v53 = vld [vmem:[%s4298_s3 + $0x16c] ss:$16 sps:$4 sm:$0xff]   ;;  %v2888_v54 = vld [vmem:[%s4298_s3 + $0x184] ss:$16 sps:$4 sm:$0xff]   ;;  %v2884_v55 = vld [vmem:[%s4298_s3 + $0x168] ss:$16 sps:$4 sm:$0xff]  }
  0x13   :  { %567 = vmatpush1.bf16.msra.mxu0 %v2830_v19  ;;  %v2893_v56 = vld [vmem:[%s4298_s3 + $0x180] ss:$16 sps:$4 sm:$0xff]   ;;  %v2892_v57 = vld [vmem:[%s4298_s3 + $0x18c] ss:$16 sps:$4 sm:$0xff]   ;;  %v2894_v58 = vld [vmem:[%s4298_s3 + $0x1a4] ss:$16 sps:$4 sm:$0xff]  }
  0x14   :  { %568 = vmatprep.subr.bf16.mxu0 %v2838_v20  ;;  %v2890_v59 = vld [vmem:[%s4298_s3 + $0x188] ss:$16 sps:$4 sm:$0xff]   ;;  %v2899_v60 = vld [vmem:[%s4298_s3 + $0x1a0] ss:$16 sps:$4 sm:$0xff]   ;;  %v2898_v61 = vld [vmem:[%s4298_s3 + $0x1ac] ss:$16 sps:$4 sm:$0xff]  }
  0x15   :  { %530 = vmatpush1.bf16.msra.mxu1 %v2845_v25  ;;  %v2896_v62 = vld [vmem:[%s4298_s3 + $0x1a8] ss:$16 sps:$4 sm:$0xff]   ;;  %v2900_v63 = vld [vmem:[%s4298_s3 + $0x1c4] ss:$16 sps:$4 sm:$0xff]   ;;  %v2904_v0 = vld [vmem:[%s4298_s3 + $0x1cc] ss:$16 sps:$4 sm:$0xff]  }
  0x16   :  { %531 = vmatprep.subr.bf16.mxu1 %v2846_v26  ;;  %v2902_v1 = vld [vmem:[%s4298_s3 + $0x1c8] ss:$16 sps:$4 sm:$0xff]   ;;  %v2905_v2 = vld [vmem:[%s4298_s3 + $0x1c0] ss:$16 sps:$4 sm:$0xff]   ;;  %v2906_v3 = vld [vmem:[%s4298_s3 + $0x1e4] ss:$16 sps:$4 sm:$0xff]  }
  0x17   :  { %569 = vmatpush1.bf16.msra.mxu0 %v2836_v23  ;;  %v2910_v4 = vld [vmem:[%s4298_s3 + $0x1ec] ss:$16 sps:$4 sm:$0xff]   ;;  %v2908_v5 = vld [vmem:[%s4298_s3 + $0x1e8] ss:$16 sps:$4 sm:$0xff]   ;;  %v2911_v6 = vld [vmem:[%s4298_s3 + $0x1e0] ss:$16 sps:$4 sm:$0xff]  }
  0x18   :  { %570 = vmatprep.subr.bf16.mxu0 %v2844_v24  ;;  %v2914_v7 = vld [vmem:[%s4300_s5 + $0x4] ss:$28 sps:$4 sm:$0xff]   ;;  %v2917_v8 = vld [vmem:[%s4300_s5 + $0xc] ss:$28 sps:$4 sm:$0xff]  }
  0x19   :  { %532 = vmatpush1.bf16.msra.mxu1 %v2851_v29 }
  0x1a   :  { %533 = vmatprep.subr.bf16.mxu1 %v2852_v30 }
  0x1b   :  { %571 = vmatpush1.bf16.msra.mxu0 %v2842_v27 }
  0x1c   :  { %572 = vmatprep.subr.bf16.mxu0 %v2850_v28 }
  0x1d   :  { %534 = vmatpush1.bf16.msra.mxu1 %v2857_v33 }
  0x1e   :  { %535 = vmatprep.subr.bf16.mxu1 %v2858_v34 }
  0x1f   :  { %573 = vmatpush1.bf16.msra.mxu0 %v2848_v31 }
  0x20   :  { %574 = vmatprep.subr.bf16.mxu0 %v2856_v32 }
  0x21   :  { %536 = vmatpush1.bf16.msra.mxu1 %v2863_v37 }
  0x22   :  { %537 = vmatprep.subr.bf16.mxu1 %v2864_v38 }
  0x23   :  { %575 = vmatpush1.bf16.msra.mxu0 %v2854_v35 }
  0x24   :  { %576 = vmatprep.subr.bf16.mxu0 %v2862_v36 }
  0x25   :  { %538 = vmatpush1.bf16.msra.mxu1 %v2869_v41 }
  0x26   :  { %539 = vmatprep.subr.bf16.mxu1 %v2870_v42 }
  0x27   :  { %577 = vmatpush1.bf16.msra.mxu0 %v2860_v39 }
  0x28   :  { %578 = vmatprep.subr.bf16.mxu0 %v2868_v40 }
  0x29   :  { %540 = vmatpush1.bf16.msra.mxu1 %v2875_v44 }
  0x2a   :  { %541 = vmatprep.subr.bf16.mxu1 %v2876_v46 }
  0x2b   :  { %579 = vmatpush1.bf16.msra.mxu0 %v2866_v43 }
  0x2c   :  { %580 = vmatprep.subr.bf16.mxu0 %v2874_v45 }
  0x2d   :  { %542 = vmatpush1.bf16.msra.mxu1 %v2881_v48 }
  0x2e   :  { %543 = vmatprep.subr.bf16.mxu1 %v2882_v50 }
  0x2f   :  { %581 = vmatpush1.bf16.msra.mxu0 %v2872_v47 }
  0x30   :  { %582 = vmatprep.subr.bf16.mxu0 %v2880_v49 }
  0x31   :  { %544 = vmatpush1.bf16.msra.mxu1 %v2887_v52 }
  0x32   :  { %545 = vmatprep.subr.bf16.mxu1 %v2888_v54 }
  0x33   :  { %583 = vmatpush1.bf16.msra.mxu0 %v2878_v51 }
  0x34   :  { %584 = vmatprep.subr.bf16.mxu0 %v2886_v53 }
  0x35   :  { %546 = vmatpush1.bf16.msra.mxu1 %v2893_v56 }
  0x36   :  { %547 = vmatprep.subr.bf16.mxu1 %v2894_v58 }
  0x37   :  { %585 = vmatpush1.bf16.msra.mxu0 %v2884_v55 }
  0x38   :  { %586 = vmatprep.subr.bf16.mxu0 %v2892_v57 }
  0x39   :  { %548 = vmatpush1.bf16.msra.mxu1 %v2899_v60 }
  0x3a   :  { %549 = vmatprep.subr.bf16.mxu1 %v2900_v63 }
  0x3b   :  { %587 = vmatpush1.bf16.msra.mxu0 %v2890_v59 }
  0x3c   :  { %588 = vmatprep.subr.bf16.mxu0 %v2898_v61 }
  0x3d   :  { %550 = vmatpush1.bf16.msra.mxu1 %v2905_v2 }
  0x3e   :  { %551 = vmatprep.subr.bf16.mxu1 %v2906_v3 }
  0x3f   :  { %589 = vmatpush1.bf16.msra.mxu0 %v2896_v62 }
  0x40   :  { %590 = vmatprep.subr.bf16.mxu0 %v2904_v0 }
  0x41   :  { %552 = vmatpush1.bf16.msra.mxu1 %v2911_v6 }
  0x42   :  { %2056 = vmatprep.subr.bf16.mxu1 %v2914_v7 }
  0x43   :  { %591 = vmatpush1.bf16.msra.mxu0 %v2902_v1 }
  0x44   :  { %592 = vmatprep.subr.bf16.mxu0 %v2910_v4 }
  0x47   :  { %593 = vmatpush1.bf16.msra.mxu0 %v2908_v5 }
  0x48   :  { %2138 = vmatprep.subr.bf16.mxu0 %v2917_v8 }
  0x49   :  { %12 = vsyncpa [#allocation3], 0  ;;  %v36_v9 = vlaneseq  ;;  %v34_v12 = vld [vmem:[%s4297_s2] sm:$0x3]  ;;  %v2915_v26 = vld [vmem:[%s4300_s5 + $0x8] ss:$28 sps:$4 sm:$0xff]  }
  0x4a   :  { %v2912_v25 = vld [vmem:[%s4300_s5] ss:$28 sps:$4 sm:$0xff]   ;;  %v2918_v30 = vld [vmem:[%s4300_s5 + $0x38] ss:$28 sps:$4 sm:$0xff]   ;;  %v2924_v34 = vld [vmem:[%s4300_s5 + $0x70] ss:$28 sps:$4 sm:$0xff]  }
  0x4b   :  { %v3539_v10 = vshrl.u32 %v36_v9, 7  ;;  %v2920_v28 = vld [vmem:[%s4300_s5 + $0x3c] ss:$28 sps:$4 sm:$0xff]   ;;  %v2923_v29 = vld [vmem:[%s4300_s5 + $0x44] ss:$28 sps:$4 sm:$0xff]   ;;  %vm2430_vm1 = vcmask 130048  }
  0x4c   :  { %v2921_v31 = vld [vmem:[%s4300_s5 + $0x40] ss:$28 sps:$4 sm:$0xff]   ;;  %v2926_v32 = vld [vmem:[%s4300_s5 + $0x74] ss:$28 sps:$4 sm:$0xff]   ;;  %v2932_v36 = vld [vmem:[%s4300_s5 + $0xac] ss:$28 sps:$4 sm:$0xff]  }
  0x4d   :  { %v3542_v11 = vsub.s32 0, %v3539_v10  ;;  %v3548_v13 = vsub.s32 1, %v3539_v10  ;;  %v2929_v33 = vld [vmem:[%s4300_s5 + $0x7c] ss:$28 sps:$4 sm:$0xff]   ;;  %v2935_v37 = vld [vmem:[%s4300_s5 + $0xb4] ss:$28 sps:$4 sm:$0xff]  }
  0x4e   :  { %v2927_v35 = vld [vmem:[%s4300_s5 + $0x78] ss:$28 sps:$4 sm:$0xff]   ;;  %v2930_v38 = vld [vmem:[%s4300_s5 + $0xa8] ss:$28 sps:$4 sm:$0xff]   ;;  %v2933_v39 = vld [vmem:[%s4300_s5 + $0xb0] ss:$28 sps:$4 sm:$0xff]  }
  0x4f   :  { %v39_v14 = vrot.slane %v34_v12, %v3542_v11  ;;  %v43_v15 = vrot.slane %v34_v12, %v3548_v13  ;;  %v2938_v40 = vld [vmem:[%s4300_s5 + $0xe4] ss:$28 sps:$4 sm:$0xff]   ;;  %v2941_v41 = vld [vmem:[%s4300_s5 + $0xec] ss:$28 sps:$4 sm:$0xff]   ;;  %v2944_v44 = vld [vmem:[%s4300_s5 + $0x11c] ss:$28 sps:$4 sm:$0xff]  }
  0x50   :  { %v2936_v42 = vld [vmem:[%s4300_s5 + $0xe0] ss:$28 sps:$4 sm:$0xff]   ;;  %v2939_v43 = vld [vmem:[%s4300_s5 + $0xe8] ss:$28 sps:$4 sm:$0xff]   ;;  %v2942_v46 = vld [vmem:[%s4300_s5 + $0x118] ss:$28 sps:$4 sm:$0xff]  }
  0x51   :  { %v2947_v45 = vld [vmem:[%s4300_s5 + $0x124] ss:$28 sps:$4 sm:$0xff]   ;;  %v2950_v48 = vld [vmem:[%s4300_s5 + $0x154] ss:$28 sps:$4 sm:$0xff]   ;;  %v2953_v49 = vld [vmem:[%s4300_s5 + $0x15c] ss:$28 sps:$4 sm:$0xff]  }
  0x52   :  { %v2945_v47 = vld [vmem:[%s4300_s5 + $0x120] ss:$28 sps:$4 sm:$0xff]   ;;  %v2948_v50 = vld [vmem:[%s4300_s5 + $0x150] ss:$28 sps:$4 sm:$0xff]   ;;  %v2951_v51 = vld [vmem:[%s4300_s5 + $0x158] ss:$28 sps:$4 sm:$0xff]  }
  0x53   :  { %v2956_v52 = vld [vmem:[%s4300_s5 + $0x18c] ss:$28 sps:$4 sm:$0xff]   ;;  %v2959_v53 = vld [vmem:[%s4300_s5 + $0x194] ss:$28 sps:$4 sm:$0xff]   ;;  %v2962_v56 = vld [vmem:[%s4300_s5 + $0x1c4] ss:$28 sps:$4 sm:$0xff]  }
  0x54   :  { %v2954_v54 = vld [vmem:[%s4300_s5 + $0x188] ss:$28 sps:$4 sm:$0xff]   ;;  %v2957_v55 = vld [vmem:[%s4300_s5 + $0x190] ss:$28 sps:$4 sm:$0xff]   ;;  %v2960_v58 = vld [vmem:[%s4300_s5 + $0x1c0] ss:$28 sps:$4 sm:$0xff]  }
  0x55   :  { %v2965_v57 = vld [vmem:[%s4300_s5 + $0x1cc] ss:$28 sps:$4 sm:$0xff]   ;;  %v2968_v60 = vld [vmem:[%s4300_s5 + $0x1fc] ss:$28 sps:$4 sm:$0xff]   ;;  %v2971_v61 = vld [vmem:[%s4300_s5 + $0x204] ss:$28 sps:$4 sm:$0xff]  }
  0x56   :  { %v2963_v59 = vld [vmem:[%s4300_s5 + $0x1c8] ss:$28 sps:$4 sm:$0xff]   ;;  %v2966_v62 = vld [vmem:[%s4300_s5 + $0x1f8] ss:$28 sps:$4 sm:$0xff]   ;;  %v2969_v63 = vld [vmem:[%s4300_s5 + $0x200] ss:$28 sps:$4 sm:$0xff]  }
  0x57   :  { %v2974_v0 = vld [vmem:[%s4300_s5 + $0x234] ss:$28 sps:$4 sm:$0xff]   ;;  %v2977_v1 = vld [vmem:[%s4300_s5 + $0x23c] ss:$28 sps:$4 sm:$0xff]   ;;  %v2980_v4 = vld [vmem:[%s4300_s5 + $0x26c] ss:$28 sps:$4 sm:$0xff]  }
  0x58   :  { %v2972_v2 = vld [vmem:[%s4300_s5 + $0x230] ss:$28 sps:$4 sm:$0xff]   ;;  %v2975_v3 = vld [vmem:[%s4300_s5 + $0x238] ss:$28 sps:$4 sm:$0xff]   ;;  %v2978_v6 = vld [vmem:[%s4300_s5 + $0x268] ss:$28 sps:$4 sm:$0xff]  }
  0x59   :  { %v2983_v5 = vld [vmem:[%s4300_s5 + $0x274] ss:$28 sps:$4 sm:$0xff]   ;;  %v2986_v8 = vld [vmem:[%s4300_s5 + $0x2a4] ss:$28 sps:$4 sm:$0xff]   ;;  %v2989_v9 = vld [vmem:[%s4300_s5 + $0x2ac] ss:$28 sps:$4 sm:$0xff]  }
  0x5a   :  { %v2981_v7 = vld [vmem:[%s4300_s5 + $0x270] ss:$28 sps:$4 sm:$0xff]   ;;  %v2984_v12 = vld [vmem:[%s4300_s5 + $0x2a0] ss:$28 sps:$4 sm:$0xff]  }
  0xdd   :  { %v104_v16 = vpop.f32.mrb[0].mxu0 }
  0xde   :  { %v105_v17 = vadd.f32 %v104_v16, %v39_v14  ;;  %v106_v18 = vpop.f32.mrb[1].mxu0  ;;  %v2987_v14 = vld [vmem:[%s4300_s5 + $0x2a8] ss:$28 sps:$4 sm:$0xff]  }
  0xdf   :  { %v107_v19 = vadd.f32 %v106_v18, %v43_v15  ;;  %v108_v20 = vpop.f32.mrb[2].mxu0  ;;  %v2992_v15 = vld [vmem:[%s4300_s5 + $0x2dc] ss:$28 sps:$4 sm:$0xff]   ;;  %v2995_v16 = vld [vmem:[%s4300_s5 + $0x2e4] ss:$28 sps:$4 sm:$0xff]  }
  0xe0   :  { %v111_v21 = vmax.f32 %v105_v17, 0.0  ;;  %v109_v22 = vpop.f32.mrb[3].mxu0  ;;  %v2990_v17 = vld [vmem:[%s4300_s5 + $0x2d8] ss:$28 sps:$4 sm:$0xff]   ;;  %v2993_v18 = vld [vmem:[%s4300_s5 + $0x2e0] ss:$28 sps:$4 sm:$0xff]  }
  0xe1   :  { %v112_v23 = vmax.f32 %v107_v19, 0.0  ;;  %v2998_v19 = vld [vmem:[%s4300_s5 + $0x314] ss:$28 sps:$4 sm:$0xff]   ;;  %v3001_v20 = vld [vmem:[%s4300_s5 + $0x31c] ss:$28 sps:$4 sm:$0xff]  }
  0xe2   :  { %v113_v27 = vpack.c.bf16 %v111_v21, %v111_v21  ;;  %v2996_v21 = vld [vmem:[%s4300_s5 + $0x310] ss:$28 sps:$4 sm:$0xff]   ;;  %v2999_v22 = vld [vmem:[%s4300_s5 + $0x318] ss:$28 sps:$4 sm:$0xff]  }
  0xe3   :  { %v114_v24 = vpack.c.bf16 %v112_v23, %v112_v23  ;;  %v3004_v23 = vld [vmem:[%s4300_s5 + $0x34c] ss:$28 sps:$4 sm:$0xff]  }
  0xe5   :  { %553 = vmatprep.mubr.bf16.mxu1 %v114_v24  ;;  %594 = vmatprep.mubr.bf16.mxu0 %v114_v24  ;;  %v3007_v24 = vld [vmem:[%s4300_s5 + $0x354] ss:$28 sps:$4 sm:$0xff]  }
  0xe6   :  { %554 = vmatmul.mubr.bf16.vlgmr.msra.gmra.mrb[0].mxu1 %v113_v27  ;;  %595 = vmatmul.mubr.bf16.vlgmr.msra.gmra.mrb[4].mxu0 %v113_v27  ;;  %v3010_v27 = vld [vmem:[%s4300_s5 + $0x384] ss:$28 sps:$4 sm:$0xff]  }
  0xe7   :  { %2057 = vmatpush1.bf16.msra.mxu1 %v2912_v25  ;;  %2139 = vmatpush1.bf16.msra.mxu0 %v2915_v26  ;;  %v3002_v25 = vld [vmem:[%s4300_s5 + $0x348] ss:$28 sps:$4 sm:$0xff]   ;;  %v3005_v26 = vld [vmem:[%s4300_s5 + $0x350] ss:$28 sps:$4 sm:$0xff]  }
  0xe8   :  { %2058 = vmatprep.subr.bf16.mxu1 %v2920_v28  ;;  %2140 = vmatprep.subr.bf16.mxu0 %v2923_v29  ;;  %v3013_v28 = vld [vmem:[%s4300_s5 + $0x38c] ss:$28 sps:$4 sm:$0xff]   ;;  %v3747_v29 = vld [vmem:[%s4299_s4] sm:$0xf] }
  0xeb   :  { %2059 = vmatpush1.bf16.msra.mxu1 %v2918_v30  ;;  %2141 = vmatpush1.bf16.msra.mxu0 %v2921_v31  ;;  %v195_v30 = vsub.s32 3, %v3539_v10  ;;  %v184_v31 = vrot.slane %v3747_v29, %v3542_v11 }
  0xec   :  { %2060 = vmatprep.subr.bf16.mxu1 %v2926_v32  ;;  %2142 = vmatprep.subr.bf16.mxu0 %v2929_v33  ;;  %v188_v32 = vrot.slane %v3747_v29, %v3548_v13 }
  0xed   :  { %v196_v33 = vrot.slane %v3747_v29, %v195_v30 }
  0xef   :  { %2061 = vmatpush1.bf16.msra.mxu1 %v2924_v34  ;;  %2143 = vmatpush1.bf16.msra.mxu0 %v2927_v35 }
  0xf0   :  { %2062 = vmatprep.subr.bf16.mxu1 %v2932_v36  ;;  %2144 = vmatprep.subr.bf16.mxu0 %v2935_v37 }
  0xf3   :  { %2063 = vmatpush1.bf16.msra.mxu1 %v2930_v38  ;;  %2145 = vmatpush1.bf16.msra.mxu0 %v2933_v39 }
  0xf4   :  { %2064 = vmatprep.subr.bf16.mxu1 %v2938_v40  ;;  %2146 = vmatprep.subr.bf16.mxu0 %v2941_v41 }
  0xf7   :  { %2065 = vmatpush1.bf16.msra.mxu1 %v2936_v42  ;;  %2147 = vmatpush1.bf16.msra.mxu0 %v2939_v43 }
  0xf8   :  { %2066 = vmatprep.subr.bf16.mxu1 %v2944_v44  ;;  %2148 = vmatprep.subr.bf16.mxu0 %v2947_v45 }
  0xfb   :  { %2067 = vmatpush1.bf16.msra.mxu1 %v2942_v46  ;;  %2149 = vmatpush1.bf16.msra.mxu0 %v2945_v47 }
  0xfc   :  { %2068 = vmatprep.subr.bf16.mxu1 %v2950_v48  ;;  %2150 = vmatprep.subr.bf16.mxu0 %v2953_v49  ;;  %v3008_v49 = vld [vmem:[%s4300_s5 + $0x380] ss:$28 sps:$4 sm:$0xff]  }
  0xff   :  { %2069 = vmatpush1.bf16.msra.mxu1 %v2948_v50  ;;  %2151 = vmatpush1.bf16.msra.mxu0 %v2951_v51  ;;  %v3011_v50 = vld [vmem:[%s4300_s5 + $0x388] ss:$28 sps:$4 sm:$0xff]  }
 0x100   :  { %2070 = vmatprep.subr.bf16.mxu1 %v2956_v52  ;;  %2152 = vmatprep.subr.bf16.mxu0 %v2959_v53  ;;  %v3016_v52 = vld [vmem:[%s4300_s5 + $0x3bc] ss:$28 sps:$4 sm:$0xff]   ;;  %v3019_v53 = vld [vmem:[%s4300_s5 + $0x3c4] ss:$28 sps:$4 sm:$0xff]  }
 0x103   :  { %2071 = vmatpush1.bf16.msra.mxu1 %v2954_v54  ;;  %2153 = vmatpush1.bf16.msra.mxu0 %v2957_v55  ;;  %v3014_v55 = vld [vmem:[%s4300_s5 + $0x3b8] ss:$28 sps:$4 sm:$0xff]  }
 0x104   :  { %2072 = vmatprep.subr.bf16.mxu1 %v2962_v56  ;;  %2154 = vmatprep.subr.bf16.mxu0 %v2965_v57  ;;  %v3017_v56 = vld [vmem:[%s4300_s5 + $0x3c0] ss:$28 sps:$4 sm:$0xff]   ;;  %v3022_v57 = vld [vmem:[%s4300_s5 + $0x3f4] ss:$28 sps:$4 sm:$0xff]  }
 0x107   :  { %2073 = vmatpush1.bf16.msra.mxu1 %v2960_v58  ;;  %2155 = vmatpush1.bf16.msra.mxu0 %v2963_v59  ;;  %v3025_v58 = vld [vmem:[%s4300_s5 + $0x3fc] ss:$28 sps:$4 sm:$0xff]   ;;  %v3020_v59 = vld [vmem:[%s4300_s5 + $0x3f0] ss:$28 sps:$4 sm:$0xff]  }
 0x108   :  { %2074 = vmatprep.subr.bf16.mxu1 %v2968_v60  ;;  %2156 = vmatprep.subr.bf16.mxu0 %v2971_v61  ;;  %v3023_v60 = vld [vmem:[%s4300_s5 + $0x3f8] ss:$28 sps:$4 sm:$0xff]   ;;  %v3028_v61 = vld [vmem:[%s4300_s5 + $0x42c] ss:$28 sps:$4 sm:$0xff]  }
 0x10b   :  { %2075 = vmatpush1.bf16.msra.mxu1 %v2966_v62  ;;  %2157 = vmatpush1.bf16.msra.mxu0 %v2969_v63  ;;  %v3031_v62 = vld [vmem:[%s4300_s5 + $0x434] ss:$28 sps:$4 sm:$0xff]   ;;  %v3026_v63 = vld [vmem:[%s4300_s5 + $0x428] ss:$28 sps:$4 sm:$0xff]  }
 0x10c   :  { %2076 = vmatprep.subr.bf16.mxu1 %v2974_v0  ;;  %2158 = vmatprep.subr.bf16.mxu0 %v2977_v1  ;;  %v3029_v0 = vld [vmem:[%s4300_s5 + $0x430] ss:$28 sps:$4 sm:$0xff]   ;;  %v3034_v1 = vld [vmem:[%s4300_s5 + $0x464] ss:$28 sps:$4 sm:$0xff]  }
 0x10f   :  { %2077 = vmatpush1.bf16.msra.mxu1 %v2972_v2  ;;  %2159 = vmatpush1.bf16.msra.mxu0 %v2975_v3  ;;  %v3037_v2 = vld [vmem:[%s4300_s5 + $0x46c] ss:$28 sps:$4 sm:$0xff]   ;;  %v3032_v3 = vld [vmem:[%s4300_s5 + $0x460] ss:$28 sps:$4 sm:$0xff]  }
 0x110   :  { %2078 = vmatprep.subr.bf16.mxu1 %v2980_v4  ;;  %2160 = vmatprep.subr.bf16.mxu0 %v2983_v5  ;;  %v3035_v4 = vld [vmem:[%s4300_s5 + $0x468] ss:$28 sps:$4 sm:$0xff]   ;;  %v3040_v5 = vld [vmem:[%s4300_s5 + $0x49c] ss:$28 sps:$4 sm:$0xff]  }
 0x113   :  { %2079 = vmatpush1.bf16.msra.mxu1 %v2978_v6  ;;  %2161 = vmatpush1.bf16.msra.mxu0 %v2981_v7  ;;  %v3043_v6 = vld [vmem:[%s4300_s5 + $0x4a4] ss:$28 sps:$4 sm:$0xff]   ;;  %v3038_v7 = vld [vmem:[%s4300_s5 + $0x498] ss:$28 sps:$4 sm:$0xff]  }
 0x114   :  { %2080 = vmatprep.subr.bf16.mxu1 %v2986_v8  ;;  %2162 = vmatprep.subr.bf16.mxu0 %v2989_v9  ;;  %v3041_v8 = vld [vmem:[%s4300_s5 + $0x4a0] ss:$28 sps:$4 sm:$0xff]   ;;  %v3046_v9 = vld [vmem:[%s4300_s5 + $0x4d4] ss:$28 sps:$4 sm:$0xff]  }
 0x117   :  { %2081 = vmatpush1.bf16.msra.mxu1 %v2984_v12  ;;  %2163 = vmatpush1.bf16.msra.mxu0 %v2987_v14  ;;  %v3049_v12 = vld [vmem:[%s4300_s5 + $0x4dc] ss:$28 sps:$4 sm:$0xff]   ;;  %v3044_v14 = vld [vmem:[%s4300_s5 + $0x4d0] ss:$28 sps:$4 sm:$0xff]  }
 0x118   :  { %2082 = vmatprep.subr.bf16.mxu1 %v2992_v15  ;;  %2164 = vmatprep.subr.bf16.mxu0 %v2995_v16  ;;  %v3047_v15 = vld [vmem:[%s4300_s5 + $0x4d8] ss:$28 sps:$4 sm:$0xff]   ;;  %v3052_v16 = vld [vmem:[%s4300_s5 + $0x50c] ss:$28 sps:$4 sm:$0xff]  }
 0x11b   :  { %2083 = vmatpush1.bf16.msra.mxu1 %v2990_v17  ;;  %2165 = vmatpush1.bf16.msra.mxu0 %v2993_v18  ;;  %v3055_v17 = vld [vmem:[%s4300_s5 + $0x514] ss:$28 sps:$4 sm:$0xff]   ;;  %v3050_v18 = vld [vmem:[%s4300_s5 + $0x508] ss:$28 sps:$4 sm:$0xff]  }
 0x11c   :  { %2084 = vmatprep.subr.bf16.mxu1 %v2998_v19  ;;  %2166 = vmatprep.subr.bf16.mxu0 %v3001_v20  ;;  %v3053_v19 = vld [vmem:[%s4300_s5 + $0x510] ss:$28 sps:$4 sm:$0xff]   ;;  %v3058_v20 = vld [vmem:[%s4300_s5 + $0x544] ss:$28 sps:$4 sm:$0xff]  }
 0x11f   :  { %2085 = vmatpush1.bf16.msra.mxu1 %v2996_v21  ;;  %2167 = vmatpush1.bf16.msra.mxu0 %v2999_v22  ;;  %v3061_v21 = vld [vmem:[%s4300_s5 + $0x54c] ss:$28 sps:$4 sm:$0xff]   ;;  %v3056_v22 = vld [vmem:[%s4300_s5 + $0x540] ss:$28 sps:$4 sm:$0xff]  }
 0x120   :  { %2086 = vmatprep.subr.bf16.mxu1 %v3004_v23  ;;  %2168 = vmatprep.subr.bf16.mxu0 %v3007_v24  ;;  %v3059_v23 = vld [vmem:[%s4300_s5 + $0x548] ss:$28 sps:$4 sm:$0xff]   ;;  %v3064_v24 = vld [vmem:[%s4300_s5 + $0x57c] ss:$28 sps:$4 sm:$0xff]  }
 0x123   :  { %2087 = vmatpush1.bf16.msra.mxu1 %v3002_v25  ;;  %2169 = vmatpush1.bf16.msra.mxu0 %v3005_v26  ;;  %v3067_v25 = vld [vmem:[%s4300_s5 + $0x584] ss:$28 sps:$4 sm:$0xff]   ;;  %v3062_v26 = vld [vmem:[%s4300_s5 + $0x578] ss:$28 sps:$4 sm:$0xff]  }
 0x124   :  { %2097 = vmatprep.subr.bf16.mxu1 %v3010_v27  ;;  %2179 = vmatprep.subr.bf16.mxu0 %v3013_v28  ;;  %v3065_v27 = vld [vmem:[%s4300_s5 + $0x580] ss:$28 sps:$4 sm:$0xff]   ;;  %v3070_v28 = vld [vmem:[%s4300_s5 + $0x5b4] ss:$28 sps:$4 sm:$0xff]  }
 0x1b9   :  { %v555_v34 = vpop.f32.mrb[0].mxu1  ;;  %v3757_v35 = vpop.f32.mrb[4].mxu0 }
 0x1ba   :  { %v556_v36 = vadd.f32 %v555_v34, %v184_v31  ;;  %v557_v37 = vpop.f32.mrb[1].mxu1  ;;  %v598_v38 = vpop.f32.mrb[5].mxu0  ;;  %v3073_v31 = vld [vmem:[%s4300_s5 + $0x5bc] ss:$28 sps:$4 sm:$0xff]   ;;  %v3076_v34 = vld [vmem:[%s4300_s5 + $0x5ec] ss:$28 sps:$4 sm:$0xff]  }
 0x1bb   :  { %v558_v39 = vadd.f32 %v557_v37, %v188_v32  ;;  %v599_v40 = vadd.f32 %v598_v38, %v196_v33  ;;  %v559_v41 = vpop.f32.mrb[2].mxu1  ;;  %v600_v42 = vpop.f32.mrb[6].mxu0  ;;  %v3068_v32 = vld [vmem:[%s4300_s5 + $0x5b0] ss:$28 sps:$4 sm:$0xff]   ;;  %v3071_v33 = vld [vmem:[%s4300_s5 + $0x5b8] ss:$28 sps:$4 sm:$0xff]  }
 0x1bc   :  { %v603_v43 = vmax.f32 %v556_v36, 0.0  ;;  %v560_v44 = vpop.f32.mrb[3].mxu1  ;;  %v601_v45 = vpop.f32.mrb[7].mxu0  ;;  %v3079_v36 = vld [vmem:[%s4300_s5 + $0x5f4] ss:$28 sps:$4 sm:$0xff]  }
 0x1bd   :  { %v604_v46 = vmax.f32 %v558_v39, 0.0  ;;  %v606_v47 = vmax.f32 %v599_v40, 0.0  ;;  %v3074_v37 = vld [vmem:[%s4300_s5 + $0x5e8] ss:$28 sps:$4 sm:$0xff]   ;;  %v3077_v38 = vld [vmem:[%s4300_s5 + $0x5f0] ss:$28 sps:$4 sm:$0xff]  }
 0x1be   :  { %v3767_v51 = vpack.c.bf16 %v603_v43, %v603_v43  ;;  %v3082_v39 = vld [vmem:[%s4300_s5 + $0x624] ss:$28 sps:$4 sm:$0xff]   ;;  %v3085_v40 = vld [vmem:[%s4300_s5 + $0x62c] ss:$28 sps:$4 sm:$0xff]   ;;  %v191_v43 = vsub.s32 2, %v3539_v10 }
 0x1bf   :  { %v3759_v48 = vpack.c.bf16 %v604_v46, %v604_v46  ;;  %v3777_v54 = vpack.c.bf16 %v606_v47, %v606_v47  ;;  %v3080_v41 = vld [vmem:[%s4300_s5 + $0x620] ss:$28 sps:$4 sm:$0xff]   ;;  %v3083_v42 = vld [vmem:[%s4300_s5 + $0x628] ss:$28 sps:$4 sm:$0xff]   ;;  %v3086_v46 = vld [vmem:[%s4300_s5 + $0x658] ss:$28 sps:$4 sm:$0xff]  }
 0x1c0   :  { %v3088_v44 = vld [vmem:[%s4300_s5 + $0x65c] ss:$28 sps:$4 sm:$0xff]   ;;  %v3091_v45 = vld [vmem:[%s4300_s5 + $0x664] ss:$28 sps:$4 sm:$0xff]  }
 0x1c1   :  { %2088 = vmatprep.mubr.bf16.mxu1 %v3759_v48  ;;  %2170 = vmatprep.mubr.bf16.mxu0 %v3759_v48  ;;  %v3089_v47 = vld [vmem:[%s4300_s5 + $0x660] ss:$28 sps:$4 sm:$0xff]  }
 0x1c2   :  { %2089 = vmatmul.mubr.bf16.vlgmr.msra.gmra.mrb[4].mxu1 %v3767_v51  ;;  %2171 = vmatmul.mubr.bf16.vlgmr.msra.gmra.mrb[8].mxu0 %v3767_v51 }
 0x1c3   :  { %2098 = vmatpush1.bf16.msra.mxu1 %v3008_v49  ;;  %2180 = vmatpush1.bf16.msra.mxu0 %v3011_v50  ;;  %v192_v49 = vrot.slane %v3747_v29, %v191_v43  ;;  %v3094_v50 = vld [vmem:[%s4300_s5 + $0x694] ss:$28 sps:$4 sm:$0xff]  }
 0x1c4   :  { %2129 = vmatprep.mubr.bf16.mxu1 %v3777_v54  ;;  %2211 = vmatprep.mubr.bf16.mxu0 %v3777_v54  ;;  %v3095_v29 = vld [vmem:[%s4300_s5 + $0x698] ss:$28 sps:$4 sm:$0xff]  }
 0x1c5   :  { %2099 = vmatprep.subr.bf16.mxu1 %v3016_v52  ;;  %2181 = vmatprep.subr.bf16.mxu0 %v3019_v53  ;;  %v3097_v52 = vld [vmem:[%s4300_s5 + $0x69c] ss:$28 sps:$4 sm:$0xff]   ;;  %v3092_v53 = vld [vmem:[%s4300_s5 + $0x690] ss:$28 sps:$4 sm:$0xff]  }
 0x1c7   :  { %2100 = vmatpush1.bf16.msra.mxu1 %v3014_v55  ;;  %2182 = vmatpush1.bf16.msra.mxu0 %v3017_v56  ;;  %v597_v55 = vadd.f32 %v3757_v35, %v192_v49  ;;  %v3100_v56 = vld [vmem:[%s4300_s5 + $0x6cc] ss:$28 sps:$4 sm:$0xff]   ;;  %v3162_v49 = vld [vmem:[%s4300_s5 + $0x600] ss:$28 sps:$4 sm:$0xff]  }
 0x1c8   :  { %2101 = vmatprep.subr.bf16.mxu1 %v3022_v57  ;;  %2183 = vmatprep.subr.bf16.mxu0 %v3025_v58  ;;  %v3103_v57 = vld [vmem:[%s4300_s5 + $0x6d4] ss:$28 sps:$4 sm:$0xff]   ;;  %v3098_v58 = vld [vmem:[%s4300_s5 + $0x6c8] ss:$28 sps:$4 sm:$0xff]  }
 0x1c9   :  { %v3101_v35 = vld [vmem:[%s4300_s5 + $0x6d0] ss:$28 sps:$4 sm:$0xff]  }
 0x1cb   :  { %2102 = vmatpush1.bf16.msra.mxu1 %v3020_v59  ;;  %2184 = vmatpush1.bf16.msra.mxu0 %v3023_v60  ;;  %v605_v59 = vmax.f32 %v597_v55, 0.0  ;;  %v3106_v60 = vld [vmem:[%s4300_s5 + $0x14] ss:$28 sps:$4 sm:$0xff]  }
 0x1cc   :  { %2103 = vmatprep.subr.bf16.mxu1 %v3028_v61  ;;  %2185 = vmatprep.subr.bf16.mxu0 %v3031_v62  ;;  %v3107_v61 = vld [vmem:[%s4300_s5 + $0x1d8] ss:$28 sps:$4 sm:$0xff]   ;;  %v3104_v62 = vld [vmem:[%s4300_s5 + $0x10] ss:$28 sps:$4 sm:$0xff]  }
 0x1cd   :  { %v3164_v55 = vld [vmem:[%s4300_s5 + $0x2b0] ss:$28 sps:$4 sm:$0xff]  }
 0x1cf   :  { %2104 = vmatpush1.bf16.msra.mxu1 %v3026_v63  ;;  %2186 = vmatpush1.bf16.msra.mxu0 %v3029_v0  ;;  %v3971_v63 = vpack.c.bf16 %v605_v59, %v605_v59  ;;  %v3108_v0 = vld [vmem:[%s4300_s5 + $0x18] ss:$28 sps:$4 sm:$0xff]   ;;  %v3173_v59 = vld [vmem:[%s4300_s5 + $0x4b0] ss:$28 sps:$4 sm:$0xff]  }
 0x1d0   :  { %2105 = vmatprep.subr.bf16.mxu1 %v3034_v1  ;;  %2187 = vmatprep.subr.bf16.mxu0 %v3037_v2  ;;  %v3111_v1 = vld [vmem:[%s4300_s5 + $0x4c] ss:$28 sps:$4 sm:$0xff]  }
 0x1d1   :  { %v3112_v2 = vld [vmem:[%s4300_s5 + $0x210] ss:$28 sps:$4 sm:$0xff]  }
 0x1d3   :  { %2106 = vmatpush1.bf16.msra.mxu1 %v3032_v3  ;;  %2188 = vmatpush1.bf16.msra.mxu0 %v3035_v4  ;;  %v3109_v3 = vld [vmem:[%s4300_s5 + $0x48] ss:$28 sps:$4 sm:$0xff]   ;;  %v3113_v4 = vld [vmem:[%s4300_s5 + $0x50] ss:$28 sps:$4 sm:$0xff]  }
 0x1d4   :  { %2107 = vmatprep.subr.bf16.mxu1 %v3040_v5  ;;  %2189 = vmatprep.subr.bf16.mxu0 %v3043_v6  ;;  %v3116_v5 = vld [vmem:[%s4300_s5 + $0x84] ss:$28 sps:$4 sm:$0xff]  }
 0x1d5   :  { %v3117_v6 = vld [vmem:[%s4300_s5 + $0x248] ss:$28 sps:$4 sm:$0xff]  }
 0x1d7   :  { %2108 = vmatpush1.bf16.msra.mxu1 %v3038_v7  ;;  %2190 = vmatpush1.bf16.msra.mxu0 %v3041_v8  ;;  %v3114_v7 = vld [vmem:[%s4300_s5 + $0x80] ss:$28 sps:$4 sm:$0xff]  }
 0x1d8   :  { %2109 = vmatprep.subr.bf16.mxu1 %v3046_v9  ;;  %2191 = vmatprep.subr.bf16.mxu0 %v3049_v12  ;;  %v3121_v8 = vld [vmem:[%s4300_s5 + $0xbc] ss:$28 sps:$4 sm:$0xff]  }
 0x1d9   :  { %v3122_v9 = vld [vmem:[%s4300_s5 + $0x280] ss:$28 sps:$4 sm:$0xff]   ;;  %v3119_v12 = vld [vmem:[%s4300_s5 + $0xb8] ss:$28 sps:$4 sm:$0xff]  }
 0x1db   :  { %2110 = vmatpush1.bf16.msra.mxu1 %v3044_v14  ;;  %2192 = vmatpush1.bf16.msra.mxu0 %v3047_v15  ;;  %v3123_v14 = vld [vmem:[%s4300_s5 + $0xc0] ss:$28 sps:$4 sm:$0xff]   ;;  %v3126_v15 = vld [vmem:[%s4300_s5 + $0xf4] ss:$28 sps:$4 sm:$0xff]  }
 0x1dc   :  { %2111 = vmatprep.subr.bf16.mxu1 %v3052_v16  ;;  %2193 = vmatprep.subr.bf16.mxu0 %v3055_v17  ;;  %v3127_v16 = vld [vmem:[%s4300_s5 + $0x2b8] ss:$28 sps:$4 sm:$0xff]   ;;  %v3124_v17 = vld [vmem:[%s4300_s5 + $0xf0] ss:$28 sps:$4 sm:$0xff]  }
 0x1df   :  { %2112 = vmatpush1.bf16.msra.mxu1 %v3050_v18  ;;  %2194 = vmatpush1.bf16.msra.mxu0 %v3053_v19  ;;  %v3128_v18 = vld [vmem:[%s4300_s5 + $0xf8] ss:$28 sps:$4 sm:$0xff]   ;;  %v3131_v19 = vld [vmem:[%s4300_s5 + $0x12c] ss:$28 sps:$4 sm:$0xff]  }
 0x1e0   :  { %2113 = vmatprep.subr.bf16.mxu1 %v3058_v20  ;;  %2195 = vmatprep.subr.bf16.mxu0 %v3061_v21  ;;  %v3132_v20 = vld [vmem:[%s4300_s5 + $0x2f0] ss:$28 sps:$4 sm:$0xff]   ;;  %v3129_v21 = vld [vmem:[%s4300_s5 + $0x128] ss:$28 sps:$4 sm:$0xff]  }
 0x1e3   :  { %2114 = vmatpush1.bf16.msra.mxu1 %v3056_v22  ;;  %2196 = vmatpush1.bf16.msra.mxu0 %v3059_v23  ;;  %v3133_v22 = vld [vmem:[%s4300_s5 + $0x130] ss:$28 sps:$4 sm:$0xff]   ;;  %v3136_v23 = vld [vmem:[%s4300_s5 + $0x164] ss:$28 sps:$4 sm:$0xff]  }
 0x1e4   :  { %2115 = vmatprep.subr.bf16.mxu1 %v3064_v24  ;;  %2197 = vmatprep.subr.bf16.mxu0 %v3067_v25  ;;  %v3137_v24 = vld [vmem:[%s4300_s5 + $0x328] ss:$28 sps:$4 sm:$0xff]   ;;  %v3134_v25 = vld [vmem:[%s4300_s5 + $0x160] ss:$28 sps:$4 sm:$0xff]  }
 0x1e7   :  { %2116 = vmatpush1.bf16.msra.mxu1 %v3062_v26  ;;  %2198 = vmatpush1.bf16.msra.mxu0 %v3065_v27  ;;  %v3138_v26 = vld [vmem:[%s4300_s5 + $0x168] ss:$28 sps:$4 sm:$0xff]   ;;  %v3141_v27 = vld [vmem:[%s4300_s5 + $0x19c] ss:$28 sps:$4 sm:$0xff]  }
 0x1e8   :  { %2117 = vmatprep.subr.bf16.mxu1 %v3070_v28  ;;  %2199 = vmatprep.subr.bf16.mxu0 %v3073_v31  ;;  %v3142_v28 = vld [vmem:[%s4300_s5 + $0x360] ss:$28 sps:$4 sm:$0xff]   ;;  %v3139_v31 = vld [vmem:[%s4300_s5 + $0x198] ss:$28 sps:$4 sm:$0xff]  }
 0x1eb   :  { %2118 = vmatpush1.bf16.msra.mxu1 %v3068_v32  ;;  %2200 = vmatpush1.bf16.msra.mxu0 %v3071_v33  ;;  %v3143_v32 = vld [vmem:[%s4300_s5 + $0x1a0] ss:$28 sps:$4 sm:$0xff]   ;;  %v3146_v33 = vld [vmem:[%s4300_s5 + $0x1d4] ss:$28 sps:$4 sm:$0xff]  }
 0x1ec   :  { %2119 = vmatprep.subr.bf16.mxu1 %v3076_v34  ;;  %2201 = vmatprep.subr.bf16.mxu0 %v3079_v36  ;;  %v3147_v34 = vld [vmem:[%s4300_s5 + $0x558] ss:$28 sps:$4 sm:$0xff]   ;;  %v3144_v36 = vld [vmem:[%s4300_s5 + $0x1d0] ss:$28 sps:$4 sm:$0xff]  }
 0x1ef   :  { %2120 = vmatpush1.bf16.msra.mxu1 %v3074_v37  ;;  %2202 = vmatpush1.bf16.msra.mxu0 %v3077_v38  ;;  %v3148_v37 = vld [vmem:[%s4300_s5 + $0x398] ss:$28 sps:$4 sm:$0xff]   ;;  %v3151_v38 = vld [vmem:[%s4300_s5 + $0x20c] ss:$28 sps:$4 sm:$0xff]  }
 0x1f0   :  { %2121 = vmatprep.subr.bf16.mxu1 %v3082_v39  ;;  %2203 = vmatprep.subr.bf16.mxu0 %v3085_v40  ;;  %v3152_v39 = vld [vmem:[%s4300_s5 + $0x590] ss:$28 sps:$4 sm:$0xff]   ;;  %v3149_v40 = vld [vmem:[%s4300_s5 + $0x208] ss:$28 sps:$4 sm:$0xff]  }
 0x1f3   :  { %2122 = vmatpush1.bf16.msra.mxu1 %v3080_v41  ;;  %2204 = vmatpush1.bf16.msra.mxu0 %v3083_v42  ;;  %v3153_v41 = vld [vmem:[%s4300_s5 + $0x3d0] ss:$28 sps:$4 sm:$0xff]   ;;  %v3156_v42 = vld [vmem:[%s4300_s5 + $0x244] ss:$28 sps:$4 sm:$0xff]  }
 0x1f4   :  { %2123 = vmatprep.subr.bf16.mxu1 %v3088_v44  ;;  %2205 = vmatprep.subr.bf16.mxu0 %v3091_v45  ;;  %v3157_v44 = vld [vmem:[%s4300_s5 + $0x5c8] ss:$28 sps:$4 sm:$0xff]   ;;  %v3154_v45 = vld [vmem:[%s4300_s5 + $0x240] ss:$28 sps:$4 sm:$0xff]  }
 0x1f7   :  { %2124 = vmatpush1.bf16.msra.mxu1 %v3086_v46  ;;  %2206 = vmatpush1.bf16.msra.mxu0 %v3089_v47  ;;  %v3158_v46 = vld [vmem:[%s4300_s5 + $0x408] ss:$28 sps:$4 sm:$0xff]   ;;  %v3161_v47 = vld [vmem:[%s4300_s5 + $0x27c] ss:$28 sps:$4 sm:$0xff]  }
 0x1f8   :  { %2125 = vmatprep.subr.bf16.mxu1 %v3094_v50  ;;  %2207 = vmatprep.subr.bf16.mxu0 %v3097_v52  ;;  %v3159_v50 = vld [vmem:[%s4300_s5 + $0x278] ss:$28 sps:$4 sm:$0xff]   ;;  %v3163_v52 = vld [vmem:[%s4300_s5 + $0x440] ss:$28 sps:$4 sm:$0xff]  }
 0x1fb   :  { %2126 = vmatpush1.bf16.msra.mxu1 %v3092_v53  ;;  %2208 = vmatpush1.bf16.msra.mxu0 %v3095_v29  ;;  %v3166_v53 = vld [vmem:[%s4300_s5 + $0x2b4] ss:$28 sps:$4 sm:$0xff]  }
 0x1fc   :  { %2127 = vmatprep.subr.bf16.mxu1 %v3100_v56  ;;  %2209 = vmatprep.subr.bf16.mxu0 %v3103_v57  ;;  %v3167_v29 = vld [vmem:[%s4300_s5 + $0x638] ss:$28 sps:$4 sm:$0xff]   ;;  %v3171_v57 = vld [vmem:[%s4300_s5 + $0x2ec] ss:$28 sps:$4 sm:$0xff]  }
 0x1fd   :  { %v3168_v56 = vld [vmem:[%s4300_s5 + $0x478] ss:$28 sps:$4 sm:$0xff]  }
 0x1ff   :  { %2128 = vmatpush1.bf16.msra.mxu1 %v3098_v58  ;;  %2210 = vmatpush1.bf16.msra.mxu0 %v3101_v35  ;;  %v3172_v58 = vld [vmem:[%s4300_s5 + $0x670] ss:$28 sps:$4 sm:$0xff]   ;;  %v3169_v35 = vld [vmem:[%s4300_s5 + $0x2e8] ss:$28 sps:$4 sm:$0xff]  }
 0x200   :  { %2220 = vmatprep.subr.bf16.mxu1 %v3106_v60  ;;  %2746 = vmatprep.subr.bf16.mxu0 %v3107_v61  ;;  %v3176_v60 = vld [vmem:[%s4300_s5 + $0x324] ss:$28 sps:$4 sm:$0xff]  }
 0x201   :  { %v3177_v61 = vld [vmem:[%s4300_s5 + $0x6a8] ss:$28 sps:$4 sm:$0xff]  }
 0x202   :  { %2130 = vmatmul.mubr.bf16.vlgmr.msra.gmra.mrb[4].mxu1 %v3971_v63  ;;  %2212 = vmatmul.mubr.bf16.vlgmr.msra.gmra.mrb[8].mxu0 %v3971_v63 }
 0x203   :  { %2221 = vmatpush1.bf16.msra.mxu1 %v3104_v62  ;;  %2252 = vmatprep.mubr.bf16.mxu1 %v3759_v48  ;;  %v3174_v62 = vld [vmem:[%s4300_s5 + $0x320] ss:$28 sps:$4 sm:$0xff]  }
 0x204   :  { %2747 = vmatpush3.bf16.msra.mxu0 %v3108_v0  ;;  %2334 = vmatprep.mubr.bf16.mxu0 %v3759_v48  ;;  %v3118_v48 = vld [vmem:[%s4300_s5 + $0x88] ss:$28 sps:$4 sm:$0xff]  }
 0x205   :  { %2222 = vmatprep.subr.bf16.mxu1 %v3111_v1  ;;  %2748 = vmatprep.subr.bf16.mxu0 %v3112_v2  ;;  %v3178_v0 = vld [vmem:[%s4300_s5 + $0x4e8] ss:$28 sps:$4 sm:$0xff]   ;;  %v3181_v1 = vld [vmem:[%s4300_s5 + $0x35c] ss:$28 sps:$4 sm:$0xff]  }
 0x206   :  { %v3182_v2 = vld [vmem:[%s4300_s5 + $0x6e0] ss:$28 sps:$4 sm:$0xff]  }
 0x207   :  { %2223 = vmatpush1.bf16.msra.mxu1 %v3109_v3  ;;  %v3179_v3 = vld [vmem:[%s4300_s5 + $0x358] ss:$28 sps:$4 sm:$0xff]  }
 0x208   :  { %2749 = vmatpush3.bf16.msra.mxu0 %v3113_v4  ;;  %2224 = vmatprep.subr.bf16.mxu1 %v3116_v5  ;;  %v3183_v4 = vld [vmem:[%s4300_s5 + $0x520] ss:$28 sps:$4 sm:$0xff]   ;;  %v3186_v5 = vld [vmem:[%s4300_s5 + $0x394] ss:$28 sps:$4 sm:$0xff]  }
 0x209   :  { %2750 = vmatprep.subr.bf16.mxu0 %v3117_v6  ;;  %v3184_v6 = vld [vmem:[%s4300_s5 + $0x390] ss:$28 sps:$4 sm:$0xff]  }
 0x20b   :  { %2225 = vmatpush1.bf16.msra.mxu1 %v3114_v7  ;;  %v3189_v7 = vld [vmem:[%s4300_s5 + $0x3cc] ss:$28 sps:$4 sm:$0xff]  }
 0x20c   :  { %2751 = vmatpush3.bf16.msra.mxu0 %v3118_v48  ;;  %2226 = vmatprep.subr.bf16.mxu1 %v3121_v8  ;;  %v3187_v48 = vld [vmem:[%s4300_s5 + $0x3c8] ss:$28 sps:$4 sm:$0xff]  }
 0x20d   :  { %2752 = vmatprep.subr.bf16.mxu0 %v3122_v9  ;;  %v3192_v8 = vld [vmem:[%s4300_s5 + $0x404] ss:$28 sps:$4 sm:$0xff]  }
 0x20e   :  { %v3190_v9 = vld [vmem:[%s4300_s5 + $0x400] ss:$28 sps:$4 sm:$0xff]  }
 0x20f   :  { %2227 = vmatpush1.bf16.msra.mxu1 %v3119_v12  ;;  %v3198_v12 = vld [vmem:[%s4300_s5 + $0x474] ss:$28 sps:$4 sm:$0xff]  }
 0x210   :  { %2753 = vmatpush3.bf16.msra.mxu0 %v3123_v14  ;;  %2228 = vmatprep.subr.bf16.mxu1 %v3126_v15  ;;  %v3196_v14 = vld [vmem:[%s4300_s5 + $0x470] ss:$28 sps:$4 sm:$0xff]  }
 0x211   :  { %2754 = vmatprep.subr.bf16.mxu0 %v3127_v16  ;;  %v3201_v15 = vld [vmem:[%s4300_s5 + $0x4ac] ss:$28 sps:$4 sm:$0xff]  }
 0x212   :  { %v3199_v16 = vld [vmem:[%s4300_s5 + $0x4a8] ss:$28 sps:$4 sm:$0xff]  }
 0x213   :  { %2229 = vmatpush1.bf16.msra.mxu1 %v3124_v17  ;;  %v3204_v17 = vld [vmem:[%s4300_s5 + $0x4e4] ss:$28 sps:$4 sm:$0xff]  }
 0x214   :  { %2755 = vmatpush3.bf16.msra.mxu0 %v3128_v18  ;;  %2230 = vmatprep.subr.bf16.mxu1 %v3131_v19  ;;  %v3202_v18 = vld [vmem:[%s4300_s5 + $0x4e0] ss:$28 sps:$4 sm:$0xff]  }
 0x215   :  { %2756 = vmatprep.subr.bf16.mxu0 %v3132_v20  ;;  %v3207_v19 = vld [vmem:[%s4300_s5 + $0x51c] ss:$28 sps:$4 sm:$0xff]  }
 0x216   :  { %v3205_v20 = vld [vmem:[%s4300_s5 + $0x518] ss:$28 sps:$4 sm:$0xff]  }
 0x217   :  { %2231 = vmatpush1.bf16.msra.mxu1 %v3129_v21  ;;  %v3210_v21 = vld [vmem:[%s4300_s5 + $0x554] ss:$28 sps:$4 sm:$0xff]  }
 0x218   :  { %2757 = vmatpush3.bf16.msra.mxu0 %v3133_v22  ;;  %2232 = vmatprep.subr.bf16.mxu1 %v3136_v23  ;;  %v3208_v22 = vld [vmem:[%s4300_s5 + $0x550] ss:$28 sps:$4 sm:$0xff]  }
 0x219   :  { %2758 = vmatprep.subr.bf16.mxu0 %v3137_v24  ;;  %v3213_v23 = vld [vmem:[%s4300_s5 + $0x58c] ss:$28 sps:$4 sm:$0xff]  }
 0x21a   :  { %v3211_v24 = vld [vmem:[%s4300_s5 + $0x588] ss:$28 sps:$4 sm:$0xff]  }
 0x21b   :  { %2233 = vmatpush1.bf16.msra.mxu1 %v3134_v25  ;;  %v3216_v25 = vld [vmem:[%s4300_s5 + $0x5c4] ss:$28 sps:$4 sm:$0xff]  }
 0x21c   :  { %2759 = vmatpush3.bf16.msra.mxu0 %v3138_v26  ;;  %2234 = vmatprep.subr.bf16.mxu1 %v3141_v27  ;;  %v3214_v26 = vld [vmem:[%s4300_s5 + $0x5c0] ss:$28 sps:$4 sm:$0xff]  }
 0x21d   :  { %2760 = vmatprep.subr.bf16.mxu0 %v3142_v28  ;;  %v3219_v27 = vld [vmem:[%s4300_s5 + $0x5fc] ss:$28 sps:$4 sm:$0xff]  }
 0x21e   :  { %v3217_v28 = vld [vmem:[%s4300_s5 + $0x5f8] ss:$28 sps:$4 sm:$0xff]  }
 0x21f   :  { %2235 = vmatpush1.bf16.msra.mxu1 %v3139_v31  ;;  %v3222_v31 = vld [vmem:[%s4300_s5 + $0x634] ss:$28 sps:$4 sm:$0xff]  }
 0x220   :  { %2761 = vmatpush3.bf16.msra.mxu0 %v3143_v32  ;;  %2236 = vmatprep.subr.bf16.mxu1 %v3146_v33  ;;  %v3220_v32 = vld [vmem:[%s4300_s5 + $0x630] ss:$28 sps:$4 sm:$0xff]  }
 0x221   :  { %2768 = vmatprep.subr.bf16.mxu0 %v3147_v34  ;;  %v3225_v33 = vld [vmem:[%s4300_s5 + $0x66c] ss:$28 sps:$4 sm:$0xff]  }
 0x222   :  { %v3223_v34 = vld [vmem:[%s4300_s5 + $0x668] ss:$28 sps:$4 sm:$0xff]  }
 0x223   :  { %2335 = vmatmul.mubr.bf16.vlgmr.msra.gmra.mrb[12].mxu0 %v3767_v51  ;;  %2237 = vmatpush1.bf16.msra.mxu1 %v3144_v36  ;;  %v3228_v36 = vld [vmem:[%s4300_s5 + $0x6a4] ss:$28 sps:$4 sm:$0xff]  }
 0x224   :  { %2769 = vmatpush3.bf16.msra.mxu0 %v3148_v37  ;;  %2374 = vmatprep.mubr.bf16.mxu0 %v3777_v54  ;;  %v3226_v37 = vld [vmem:[%s4300_s5 + $0x6a0] ss:$28 sps:$4 sm:$0xff]  }
 0x225   :  { %2238 = vmatprep.subr.bf16.mxu1 %v3151_v38  ;;  %2770 = vmatprep.subr.bf16.mxu0 %v3152_v39  ;;  %v3231_v38 = vld [vmem:[%s4300_s5 + $0x6dc] ss:$28 sps:$4 sm:$0xff]  }
 0x226   :  { %v3229_v39 = vld [vmem:[%s4300_s5 + $0x6d8] ss:$28 sps:$4 sm:$0xff]  }
 0x227   :  { %2239 = vmatpush1.bf16.msra.mxu1 %v3149_v40  ;;  %v4265_v40 = vld [vmem:[%s4301_s6] sm:$0x7f] }
 0x228   :  { %2771 = vmatpush3.bf16.msra.mxu0 %v3153_v41  ;;  %2240 = vmatprep.subr.bf16.mxu1 %v3156_v42  ;;  %v872_v41 = vrot.slane %v4265_v40, %v3542_v11  ;;  %v880_v42 = vrot.slane %v4265_v40, %v191_v43 }
 0x229   :  { %2772 = vmatprep.subr.bf16.mxu0 %v3157_v44  ;;  %v876_v44 = vrot.slane %v4265_v40, %v3548_v13 }
 0x22b   :  { %2241 = vmatpush1.bf16.msra.mxu1 %v3154_v45  ;;  %v884_v45 = vrot.slane %v4265_v40, %v195_v30 }
 0x22c   :  { %2773 = vmatpush3.bf16.msra.mxu0 %v3158_v46  ;;  %2242 = vmatprep.subr.bf16.mxu1 %v3161_v47 }
 0x22d   :  { %2774 = vmatprep.subr.bf16.mxu0 %v3162_v49 }
 0x22f   :  { %2243 = vmatpush1.bf16.msra.mxu1 %v3159_v50 }
 0x230   :  { %2775 = vmatpush3.bf16.msra.mxu0 %v3163_v52  ;;  %2244 = vmatprep.subr.bf16.mxu1 %v3166_v53 }
 0x231   :  { %2776 = vmatprep.subr.bf16.mxu0 %v3167_v29 }
 0x233   :  { %2245 = vmatpush1.bf16.msra.mxu1 %v3164_v55 }
 0x234   :  { %2777 = vmatpush3.bf16.msra.mxu0 %v3168_v56  ;;  %2246 = vmatprep.subr.bf16.mxu1 %v3171_v57 }
 0x235   :  { %2778 = vmatprep.subr.bf16.mxu0 %v3172_v58 }
 0x237   :  { %2247 = vmatpush1.bf16.msra.mxu1 %v3169_v35 }
 0x238   :  { %2779 = vmatpush3.bf16.msra.mxu0 %v3173_v59  ;;  %2248 = vmatprep.subr.bf16.mxu1 %v3176_v60 }
 0x239   :  { %2780 = vmatprep.subr.bf16.mxu0 %v3177_v61 }
 0x23b   :  { %2249 = vmatpush1.bf16.msra.mxu1 %v3174_v62 }
 0x23c   :  { %2781 = vmatpush3.bf16.msra.mxu0 %v3178_v0  ;;  %2250 = vmatprep.subr.bf16.mxu1 %v3181_v1 }
 0x23d   :  { %2782 = vmatprep.subr.bf16.mxu0 %v3182_v2 }
 0x23f   :  { %2251 = vmatpush1.bf16.msra.mxu1 %v3179_v3 }
 0x240   :  { %2783 = vmatpush3.bf16.msra.mxu0 %v3183_v4  ;;  %2261 = vmatprep.subr.bf16.mxu1 %v3186_v5 }
 0x242   :  { %2253 = vmatmul.mubr.bf16.vlgmr.msra.gmra.mrb[8].mxu1 %v3767_v51  ;;  %v3195_v51 = vld [vmem:[%s4300_s5 + $0x43c] ss:$28 sps:$4 sm:$0xff]  }
 0x243   :  { %2375 = vmatmul.mubr.bf16.vlgmr.msra.gmra.mrb[16].mxu0 %v3971_v63  ;;  %2262 = vmatpush1.bf16.msra.mxu1 %v3184_v6 }
 0x244   :  { %2293 = vmatprep.mubr.bf16.mxu1 %v3777_v54  ;;  %2263 = vmatprep.subr.bf16.mxu1 %v3189_v7  ;;  %v3193_v54 = vld [vmem:[%s4300_s5 + $0x438] ss:$28 sps:$4 sm:$0xff]   ;;  %s3285_s5 = smov [#allocation2]  }
 0x245   :  { %s2438_s6 = sshll.u32 %s3285_s5, 4  ;;  %s2439_s6 = int_to_ptr.vmem [resolvable:$true] %s2438_s6 }
 0x246   :  { %s3260_s20 = scalar_lea.vmem %s2439_s6, 896  ;;  %p3265_p1 = scmp.lt.s32.totalorder %s2439_s6, %s2439_s6 }
 0x247   :  { %2264 = vmatpush1.bf16.msra.mxu1 %v3187_v48  ;;  %p3261_p0 = scmp.ne.s32.totalorder %s2439_s6, %s3260_s20  ;;  %p3266_p2 = scmp.lt.s32.totalorder %s3260_s20, %s3260_s20 }
 0x248   :  { %2265 = vmatprep.subr.bf16.mxu1 %v3192_v8 }
 0x249   :  { %p3267_p3 = por %p3266_p2, %p3265_p1 }
 0x24b   :  { %2266 = vmatpush1.bf16.msra.mxu1 %v3190_v9  ;;  %p3268_p4 = pnand %p3267_p3, %p3261_p0 }
 0x24c   :  { %2267 = vmatprep.subr.bf16.mxu1 %v3195_v51 }
 0x24f   :  { %2268 = vmatpush1.bf16.msra.mxu1 %v3193_v54  ;;  %v895_v54 = vsub.s32 6, %v3539_v10 }
 0x250   :  { %2269 = vmatprep.subr.bf16.mxu1 %v3198_v12 }
 0x251   :  { %v896_v12 = vrot.slane %v4265_v40, %v895_v54 }
 0x253   :  { %2270 = vmatpush1.bf16.msra.mxu1 %v3196_v14 }
 0x254   :  { %2271 = vmatprep.subr.bf16.mxu1 %v3201_v15 }
 0x257   :  { %2272 = vmatpush1.bf16.msra.mxu1 %v3199_v16 }
 0x258   :  { %2273 = vmatprep.subr.bf16.mxu1 %v3204_v17 }
 0x25b   :  { %2274 = vmatpush1.bf16.msra.mxu1 %v3202_v18 }
 0x25c   :  { %2275 = vmatprep.subr.bf16.mxu1 %v3207_v19 }
 0x25f   :  { %2276 = vmatpush1.bf16.msra.mxu1 %v3205_v20 }
 0x260   :  { %2277 = vmatprep.subr.bf16.mxu1 %v3210_v21 }
 0x263   :  { %2278 = vmatpush1.bf16.msra.mxu1 %v3208_v22 }
 0x264   :  { %2279 = vmatprep.subr.bf16.mxu1 %v3213_v23 }
 0x267   :  { %2280 = vmatpush1.bf16.msra.mxu1 %v3211_v24 }
 0x268   :  { %2281 = vmatprep.subr.bf16.mxu1 %v3216_v25  ;;  %v887_v25 = vsub.s32 4, %v3539_v10 }
 0x26b   :  { %2282 = vmatpush1.bf16.msra.mxu1 %v3214_v26  ;;  %v891_v26 = vsub.s32 5, %v3539_v10 }
 0x26c   :  { %2283 = vmatprep.subr.bf16.mxu1 %v3219_v27  ;;  %v888_v27 = vrot.slane %v4265_v40, %v887_v25 }
 0x26f   :  { %2284 = vmatpush1.bf16.msra.mxu1 %v3217_v28  ;;  %v892_v28 = vrot.slane %v4265_v40, %v891_v26 }
 0x270   :  { %2285 = vmatprep.subr.bf16.mxu1 %v3222_v31 }
 0x273   :  { %2286 = vmatpush1.bf16.msra.mxu1 %v3220_v32 }
 0x274   :  { %2287 = vmatprep.subr.bf16.mxu1 %v3225_v33 }
 0x277   :  { %2288 = vmatpush1.bf16.msra.mxu1 %v3223_v34 }
 0x278   :  { %2289 = vmatprep.subr.bf16.mxu1 %v3228_v36 }
 0x27b   :  { %2290 = vmatpush1.bf16.msra.mxu1 %v3226_v37 }
 0x27c   :  { %2291 = vmatprep.subr.bf16.mxu1 %v3231_v38 }
 0x27f   :  { %2292 = vmatpush1.bf16.msra.mxu1 %v3229_v39 }
 0x282   :  { %2294 = vmatmul.mubr.bf16.vlgmr.msra.gmra.mrb[8].mxu1 %v3971_v63 }
 0x2d5   :  { %v2131_v63 = vpop.f32.mrb[4].mxu1  ;;  %v2213_v46 = vpop.f32.mrb[8].mxu0 }
 0x2d6   :  { %v2790_v47 = vadd.f32 %v2131_v63, %v872_v41  ;;  %v2792_v49 = vadd.f32 %v2213_v46, %v880_v42  ;;  %v2133_v50 = vpop.f32.mrb[5].mxu1  ;;  %v2215_v52 = vpop.f32.mrb[9].mxu0 }
 0x2d7   :  { %v2791_v53 = vadd.f32 %v2133_v50, %v876_v44  ;;  %v2793_v29 = vadd.f32 %v2215_v52, %v884_v45  ;;  %v2135_v11 = vpop.f32.mrb[6].mxu1  ;;  %v2217_v55 = vpop.f32.mrb[10].mxu0 }
 0x2d8   :  { %v2739_v56 = vmul.f32 -1.442695, %v2790_v47  ;;  %v2741_v57 = vmul.f32 -1.442695, %v2792_v49  ;;  %v2136_v43 = vpop.f32.mrb[7].mxu1  ;;  %v2218_v58 = vpop.f32.mrb[11].mxu0 }
 0x2d9   :  { %v2740_v35 = vmul.f32 -1.442695, %v2791_v53  ;;  %v2742_v13 = vmul.f32 -1.442695, %v2793_v29 }
 0x2da   :  { %3232 = vpow2.f32 %v2739_v56 }
 0x2db   :  { %3234 = vpow2.f32 %v2741_v57 }
 0x2dc   :  { %3236 = vpow2.f32 %v2740_v35 }
 0x2dd   :  { %3238 = vpow2.f32 %v2742_v13 }
 0x2e4   :  { %v3233_v30 = vpop.eup %3232 }
 0x2e5   :  { %v3235_v59 = vpop.eup %3234  ;;  %v2403_v60 = vadd.f32 1.0, %v3233_v30 }
 0x2e6   :  { %v3237_v61 = vpop.eup %3236  ;;  %v2405_v62 = vadd.f32 1.0, %v3235_v59 }
 0x2e7   :  { %v3239_v0 = vpop.eup %3238  ;;  %3240 = vrcp.f32 %v2403_v60  ;;  %v2404_v1 = vadd.f32 1.0, %v3237_v61 }
 0x2e8   :  { %3242 = vrcp.f32 %v2405_v62  ;;  %v2406_v2 = vadd.f32 1.0, %v3239_v0 }
 0x2e9   :  { %3244 = vrcp.f32 %v2404_v1 }
 0x2ea   :  { %3246 = vrcp.f32 %v2406_v2 }
 0x2f1   :  { %v3241_v3 = vpop.eup %3240 }
 0x2f2   :  { %v3243_v4 = vpop.eup %3242  ;;  %2424 = vst [vmem:[#allocation2] sm:$0xff] %v3241_v3 }
 0x2f3   :  { %v3245_v5 = vpop.eup %3244  ;;  %2426 = vst [vmem:[#allocation2 + $0x10] sm:$0xff] %v3243_v4 }
 0x2f4   :  { %v3247_v6 = vpop.eup %3246  ;;  %2425 = vst [vmem:[#allocation2 + $0x8] sm:$0xff] %v3245_v5 }
 0x2f5   :  { %2427 = vst [vmem:[#allocation2 + $0x18] sm:$0xff] %v3247_v6 }
 0x2f6   :  { %v2762_v7 = vpop.f32.mrb[12].mxu0 }
 0x2f7   :  { %v2763_v48 = vpop.f32.mrb[13].mxu0 }
 0x2f8   :  { %v2764_v8 = vadd.f32 %v2763_v48, %v2762_v7  ;;  %v2765_v9 = vpop.f32.mrb[14].mxu0 }
 0x2f9   :  { %v2766_v51 = vpop.f32.mrb[15].mxu0 }
 0x2fa   :  { %v2337_v16 = vadd.f32 %v2764_v8, %v896_v12 }
 0x316   :  { %v2784_v14 = vpop.f32.mrb[16].mxu0 }
 0x317   :  { %v2785_v15 = vpop.f32.mrb[17].mxu0 }
 0x318   :  { %v2786_v17 = vadd.f32 %v2785_v15, %v2784_v14  ;;  %v2787_v18 = vpop.f32.mrb[18].mxu0 }
 0x319   :  { %v2788_v19 = vpop.f32.mrb[19].mxu0 }
 0x31a   :  { %v2377_v20 = vadd.f32 %v2786_v17, %v2337_v16 }
 0x31c   :  { %v2745_v21 = vmul.f32 -1.442695, %v2377_v20 }
 0x31e   :  { %3248 = vpow2.f32 %v2745_v21 }
 0x328   :  { %v3249_v22 = vpop.eup %3248 }
 0x329   :  { %v2409_v23 = vadd.f32 1.0, %v3249_v22 }
 0x32b   :  { %3250 = vrcp.f32 %v2409_v23 }
 0x335   :  { %v3251_v24 = vpop.eup %3250 }
 0x336   :  { %2431 = vst.msk [vmem:[#allocation2 + $0x30] sm:$0xff] %vm2430_vm1, %v3251_v24 }
 0x355   :  { %v2295_v31 = vpop.f32.mrb[8].mxu1 }
 0x356   :  { %v2794_v32 = vadd.f32 %v2295_v31, %v888_v27  ;;  %v2297_v33 = vpop.f32.mrb[9].mxu1 }
 0x357   :  { %v2795_v34 = vadd.f32 %v2297_v33, %v892_v28  ;;  %v2299_v36 = vpop.f32.mrb[10].mxu1 }
 0x358   :  { %v2743_v37 = vmul.f32 -1.442695, %v2794_v32  ;;  %v2300_v38 = vpop.f32.mrb[11].mxu1 }
 0x359   :  { %v2744_v39 = vmul.f32 -1.442695, %v2795_v34 }
 0x35a   :  { %3252 = vpow2.f32 %v2743_v37 }
 0x35b   :  { %3254 = vpow2.f32 %v2744_v39 }
 0x364   :  { %v3253_v41 = vpop.eup %3252 }
 0x365   :  { %v3255_v42 = vpop.eup %3254  ;;  %v2407_v44 = vadd.f32 1.0, %v3253_v41 }
 0x366   :  { %v2408_v45 = vadd.f32 1.0, %v3255_v42 }
 0x367   :  { %3256 = vrcp.f32 %v2407_v44 }
 0x368   :  { %3258 = vrcp.f32 %v2408_v45 }
 0x371   :  { %v3257_v10 = vpop.eup %3256 }
 0x372   :  { %v3259_v40 = vpop.eup %3258  ;;  %2428 = vst [vmem:[#allocation2 + $0x20] sm:$0xff] %v3257_v10 }
 0x373   :  { %2429 = vst [vmem:[#allocation2 + $0x28] sm:$0xff] %v3259_v40 }
 0x374   :  { %3271 = shalt.err (!%p3268_p4)
}
 0x375   :  { %s3272_s23 = scalar_lea.hbm %s4302_s7, 896 }
 0x376   :  { %p3273_p5 = scmp.ne.s32.totalorder %s4302_s7, %s3272_s23  ;;  %p3276_p6 = scmp.lt.u32.totalorder %s3272_s23, %s4302_s7 }
 0x378   :  { %p3278_p7 = pnand %p3276_p6, %p3273_p5 }
 0x37a   :  { %3281 = shalt.err (!%p3278_p7)
}
 0x37b   :  { %2441 = dma.vmem_to_hbm [thread:$0]  %s2439_s6, 896, %s4302_s7, [#allocation3]  }
 0x37c   :  { %3282 = dma.done.wait [#allocation3], 896  }
 0x37d   :  { %3283 = vsyncadd [#allocation3], 4294966400 }
 0x37e   :  { %2445 = vsyncpa [#allocation3], 1 }

</bundles_post_ra>
